<compile_context>
chip_gen: v5e
topology: v5e:2x2
jax: 0.10.0
libtpu: 0.0.40
codegen_flags: <defaults>
</compile_context>

<pallas_src>
import jax
import jax.numpy as jnp
from jax.experimental import pallas as pl
from jax.experimental.pallas import tpu as pltpu


def _round_up(x, m):
    return ((x + m - 1) // m) * m


# ---------------------------------------------------------------------------
# Pallas kernel: in-kernel upsample + fused weight_net + fusion + bottleneck
# ---------------------------------------------------------------------------
def _ctx_kernel(feats_ref, coef_ref, pooled_ref, wrep_ref, bwn_ref,
                wbn_a_ref, wbn_b_ref, bbn_ref, out_ref):
    f = feats_ref[0]                      # (T, C)        original features
    coef = coef_ref[...]                  # (T, SPp)      per-pixel bilinear coeffs
    pooled = pooled_ref[0]                # (SPp, 2*S*C)  [pooled | -pooled @ Wwn_bd]
    C = f.shape[1]
    SC = pooled.shape[1] // 2
    S = SC // C

    # Bottleneck half that only needs f — independent of the sigmoid chain.
    y = jnp.dot(f, wbn_b_ref[...], preferred_element_type=jnp.float32)

    # One (T, SPp) @ (SPp, 2*S*C) MXU pass produces the upsampled pyramid AND
    # the pre-multiplied -ms @ Wwn term in a single 256-lane-wide result.
    t = jnp.dot(coef, pooled, preferred_element_type=jnp.float32)
    ms = t[:, :SC]                                                    # (T, S*C)

    # weight_net logits for all scales:
    #   (f - ms) @ blockdiag(Wwn) + b  =  f @ [Wwn]*S  +  (-ms @ blockdiag(Wwn))
    logits = (t[:, SC:]
              + jnp.dot(f, wrep_ref[...], preferred_element_type=jnp.float32)
              + bwn_ref[...])
    w = jax.nn.sigmoid(logits)                                        # (T, S*C)

    # Weighted fusion across the S scale blocks (static lane slices).
    num = ms[:, :C] * w[:, :C]
    den = w[:, :C]
    for i in range(1, S):
        sl = slice(i * C, (i + 1) * C)
        num = num + ms[:, sl] * w[:, sl]
        den = den + w[:, sl]
    # approx=True would loosen the 1e-4 tolerance; keep the exact reciprocal.
    overall = num * pl.reciprocal(den, approx=False)

    # Bottleneck 1x1 conv on concat([overall, f]) — without the concat.
    y = y + jnp.dot(overall, wbn_a_ref[...], preferred_element_type=jnp.float32)
    y = y + bbn_ref[...]
    out_ref[0] = jnp.maximum(y, 0.0).astype(out_ref.dtype)


# ---------------------------------------------------------------------------
# Plain-JAX glue (tiny tensors only)
# ---------------------------------------------------------------------------
def _adaptive_avg_pool(x, s):
    # x: (N, C, H, W) -> (N, C, s, s), PyTorch AdaptiveAvgPool2d bin semantics.
    _, _, H, W = x.shape
    hs = [(i * H) // s for i in range(s)]
    he = [-((-(i + 1) * H) // s) for i in range(s)]
    ws = [(j * W) // s for j in range(s)]
    we = [-((-(j + 1) * W) // s) for j in range(s)]
    rows = []
    for i in range(s):
        cols = [x[:, :, hs[i]:he[i], ws[j]:we[j]].mean(axis=(2, 3))
                for j in range(s)]
        rows.append(jnp.stack(cols, axis=-1))
    return jnp.stack(rows, axis=-2)            # (N, C, s, s)


def _bilinear_matrix(out_size, in_size):
    # PyTorch bilinear upsample, align_corners=False semantics.
    scale = in_size / out_size
    dst = jnp.arange(out_size, dtype=jnp.float32)
    src = jnp.maximum((dst + 0.5) * scale - 0.5, 0.0)
    lo = jnp.floor(src).astype(jnp.int32)
    lo = jnp.minimum(lo, in_size - 1)
    hi = jnp.minimum(lo + 1, in_size - 1)
    frac = src - lo.astype(jnp.float32)
    M = jnp.zeros((out_size, in_size), jnp.float32)
    M = M.at[jnp.arange(out_size), lo].add(1.0 - frac)
    M = M.at[jnp.arange(out_size), hi].add(frac)
    return M                                   # (out_size, in_size)


def _build_pyramid_operands(feats, params, sizes, HW_pad):
    """Per-pixel bilinear coefficients + packed pooled pyramid operand."""
    N, C, H, W = feats.shape
    HW = H * W
    S = len(sizes)
    SP = sum(s * s for s in sizes)
    SPp = _round_up(SP, 8)                     # pad K dim for clean layout
    SC = S * C

    wwn_t = params["w_weight_net"].T.astype(jnp.float32)             # (C, C) in->out
    wwn_bd = jnp.kron(jnp.eye(S, dtype=jnp.float32), wwn_t)          # (S*C, S*C)

    pooled_bd = jnp.zeros((N, SPp, SC), jnp.float32)
    coef_cols = []
    off = 0
    for idx, (s, w_scale) in enumerate(zip(sizes, params["w_scales"])):
        pooled = _adaptive_avg_pool(feats, s)                        # (N,C,s,s)
        pooled = jnp.einsum("oc,ncij->noij", w_scale, pooled)        # 1x1 conv (no bias)
        pooled = pooled.reshape(N, C, s * s).transpose(0, 2, 1)      # (N,s*s,C)
        pooled_bd = pooled_bd.at[:, off:off + s * s,
                                 idx * C:(idx + 1) * C].set(pooled)
        Mh = _bilinear_matrix(H, s)
        Mw = _bilinear_matrix(W, s)
        coef_s = jnp.einsum("hi,wj->hwij", Mh, Mw).reshape(HW, s * s)
        coef_cols.append(coef_s)
        off += s * s
    coef = jnp.concatenate(coef_cols, axis=1)                        # (HW, SP)
    coef = jnp.pad(coef, ((0, HW_pad - HW), (0, SPp - SP)))

    # Fold the block-diagonal weight_net matmul into the pooled operand, so
    # coef @ pooled_cat = [ms | -ms @ Wwn_bd] in a single 256-wide MXU pass.
    neg = -jnp.einsum("npk,kl->npl", pooled_bd, wwn_bd)
    pooled_cat = jnp.concatenate([pooled_bd, neg], axis=-1)          # (N, SPp, 2*SC)
    return coef, pooled_cat, SPp, SC


# ---------------------------------------------------------------------------
# Wrapper
# ---------------------------------------------------------------------------
def contextual_module(feats, params, sizes=(1, 2, 3, 6), tile=2048):
    N, C, H, W = feats.shape
    O = params["b_bottleneck"].shape[0]
    S = len(sizes)
    HW = H * W
    O_pad = _round_up(O, 128)          # lane-dense output stores, always

    # Tile selection: big tiles amortize the ~0.35us per-step overhead, but
    # keep >= 4 total grid steps so both v7x TensorCores get work and DMA
    # overlaps compute even for small N*H*W.
    tile = max(8, min(_round_up(tile, 8), _round_up(HW, 8)))
    min_steps = 4
    if N * pl.cdiv(HW, tile) < min_steps:
        tiles_wanted = max(1, -(-min_steps // N))
        tile = max(8, _round_up(-(-HW // tiles_wanted), 8))
    HW_pad = _round_up(HW, tile)

    coef, pooled_cat, SPp, SC = _build_pyramid_operands(feats, params, sizes, HW_pad)

    feats_nhwc = jnp.transpose(feats, (0, 2, 3, 1)).reshape(N, HW, C)
    feats_nhwc = feats_nhwc.astype(jnp.float32)
    if HW_pad != HW:
        feats_nhwc = jnp.pad(feats_nhwc, ((0, 0), (0, HW_pad - HW), (0, 0)))

    # Packed weights (PyTorch conv weights are (out, in); kernel wants (in, out)).
    wwn_t = params["w_weight_net"].T.astype(jnp.float32)             # (C, C)
    wrep = jnp.tile(wwn_t, (1, S))                                   # (C, S*C)
    bwn_rep = jnp.tile(params["b_weight_net"].astype(jnp.float32).reshape(1, C),
                       (1, S))                                       # (1, S*C)
    wbn = params["w_bottleneck"].astype(jnp.float32)                 # (O, 2C)
    wbn_a = jnp.pad(wbn[:, :C].T, ((0, 0), (0, O_pad - O)))          # (C, O_pad) overall half
    wbn_b = jnp.pad(wbn[:, C:].T, ((0, 0), (0, O_pad - O)))          # (C, O_pad) feats half
    bbn = jnp.pad(params["b_bottleneck"].astype(jnp.float32),
                  (0, O_pad - O)).reshape(1, O_pad)

    P = N * HW_pad
    cost = pl.CostEstimate(
        flops=2 * P * (SPp * 2 * SC + C * SC + 2 * C * O_pad),
        transcendentals=P * SC,
        # coef is streamed once (not once per batch element) after the reorder.
        bytes_accessed=4 * (P * (C + O_pad) + HW_pad * SPp
                            + N * SPp * 2 * SC
                            + C * SC + SC + 2 * C * O_pad + O_pad),
    )

    # Explicit VMEM budget: double-buffered feats/coef/out tiles, resident
    # weights, and ~8 live (tile, 256) f32 temporaries (t, ms, logits, w, y...).
    vmem_est = 4 * (2 * tile * (C + SPp) + 2 * tile * O_pad
                    + SPp * 2 * SC + C * SC + SC + 2 * C * O_pad + O_pad
                    + 8 * tile * max(2 * SC, O_pad))
    vmem_limit = int(min(max(vmem_est + (4 << 20), 32 << 20), 60 << 20))

    out = pl.pallas_call(
        _ctx_kernel,
        out_shape=jax.ShapeDtypeStruct((N, HW_pad, O_pad), feats.dtype),
        grid_spec=pltpu.PrefetchScalarGridSpec(
            num_scalar_prefetch=0,
            # pixel tiles OUTER, batch INNER: coef's block index is constant
            # along the inner axis, so its tile stays VMEM-resident across N.
            grid=(HW_pad // tile, N),
            in_specs=[
                pl.BlockSpec((1, tile, C), lambda t, n: (n, t, 0)),     # feats
                pl.BlockSpec((tile, SPp), lambda t, n: (t, 0)),         # bilinear coeffs
                pl.BlockSpec((1, SPp, 2 * SC), lambda t, n: (n, 0, 0)), # [pooled | -pooled@Wwn]
                pl.BlockSpec((C, SC), lambda t, n: (0, 0)),             # weight_net W, tiled S times
                pl.BlockSpec((1, SC), lambda t, n: (0, 0)),             # weight_net b, tiled S times
                pl.BlockSpec((C, O_pad), lambda t, n: (0, 0)),          # bottleneck W (overall half)
                pl.BlockSpec((C, O_pad), lambda t, n: (0, 0)),          # bottleneck W (feats half)
                pl.BlockSpec((1, O_pad), lambda t, n: (0, 0)),          # bottleneck b
            ],
            out_specs=pl.BlockSpec((1, tile, O_pad), lambda t, n: (n, t, 0)),
        ),
        compiler_params=pltpu.CompilerParams(
            dimension_semantics=("parallel", "parallel"),
            vmem_limit_bytes=vmem_limit),
        cost_estimate=cost,
    )(feats_nhwc, coef, pooled_cat, wrep, bwn_rep, wbn_a, wbn_b, bbn)

    out = out[:, :HW, :O].reshape(N, H, W, O)
    return jnp.transpose(out, (0, 3, 1, 2))                          # NCHW


# ---------------------------------------------------------------------------
# Pure-JAX reference (same semantics, NCHW) for the correctness check
# ---------------------------------------------------------------------------
def _multi_scales_ref(feats, params, sizes):
    _, _, H, W = feats.shape
    ms = []
    for size, w_scale in zip(sizes, params["w_scales"]):
        pooled = _adaptive_avg_pool(feats, size)                     # (N,C,s,s)
        pooled = jnp.einsum("oc,ncij->noij", w_scale, pooled)
        Mh = _bilinear_matrix(H, size)
        Mw = _bilinear_matrix(W, size)
        ms.append(jnp.einsum("hi,wj,ncij->nchw", Mh, Mw, pooled))
    return ms


def reference(feats, params, sizes=(1, 2, 3, 6)):
    ms_list = _multi_scales_ref(feats, params, sizes)
    wwn, bwn = params["w_weight_net"], params["b_weight_net"]
    weights = [jax.nn.sigmoid(
        jnp.einsum("oc,nchw->nohw", wwn, feats - m) + bwn[None, :, None, None])
        for m in ms_list]
    num = sum(m * w for m, w in zip(ms_list, weights))
    den = sum(weights)
    overall = num / den
    cat = jnp.concatenate([overall, feats], axis=1)
    y = (jnp.einsum("oc,nchw->nohw", params["w_bottleneck"], cat)
         + params["b_bottleneck"][None, :, None, None])
    return jax.nn.relu(y)


# ---------------------------------------------------------------------------
if __name__ == "__main__":
    N, C, H, W = 2, 32, 16, 16        # features = 32
    O = 128                           # out_features (already a lane-dense multiple of 128)
    sizes = (1, 2, 3, 6)

    key = jax.random.PRNGKey(0)
    ks = jax.random.split(key, 9)
    params = {
        "w_scales": [0.1 * jax.random.normal(ks[i], (C, C), jnp.float32)
                     for i in range(4)],
        "w_weight_net": 0.1 * jax.random.normal(ks[4], (C, C), jnp.float32),
        "b_weight_net": 0.1 * jax.random.normal(ks[5], (C,), jnp.float32),
        "w_bottleneck": 0.1 * jax.random.normal(ks[6], (O, 2 * C), jnp.float32),
        "b_bottleneck": 0.1 * jax.random.normal(ks[7], (O,), jnp.float32),
    }
    feats = jax.random.normal(ks[8], (N, C, H, W), jnp.float32)

    out = contextual_module(feats, params, sizes)
    out = jax.block_until_ready(out)

    ref = jax.block_until_ready(reference(feats, params, sizes))
    assert out.shape == (N, O, H, W)
    assert jnp.max(jnp.abs(out - ref)) < 1e-4, "mismatch vs pure-JAX reference"

    print("KERNEL_OK")
</pallas_src>

<mosaic_0001>
module attributes {stable_mosaic.version = 11 : i64} {
  func.func @_ctx_kernel(%arg0: i32, %arg1: i32, %arg2: memref<1x128x32xf32, #tpu.memory_space<vmem>>, %arg3: memref<128x56xf32, #tpu.memory_space<vmem>>, %arg4: memref<1x56x256xf32, #tpu.memory_space<vmem>>, %arg5: memref<32x128xf32, #tpu.memory_space<vmem>>, %arg6: memref<1x128xf32, #tpu.memory_space<vmem>>, %arg7: memref<32x128xf32, #tpu.memory_space<vmem>>, %arg8: memref<32x128xf32, #tpu.memory_space<vmem>>, %arg9: memref<1x128xf32, #tpu.memory_space<vmem>>, %arg10: memref<1x128x128xf32, #tpu.memory_space<vmem>>) attributes {dimension_semantics = [#tpu.dimension_semantics<parallel>, #tpu.dimension_semantics<parallel>], iteration_bounds = array<i64: 2, 2>, scalar_prefetch = 0 : i64, scratch_operands = 0 : i64, tpu.core_type = #tpu.core_type<tc>, window_params = [{transform_indices = @transform_0, window_bounds = array<i64: 1, 128, 32>}, {transform_indices = @transform_1, window_bounds = array<i64: 128, 56>}, {transform_indices = @transform_2, window_bounds = array<i64: 1, 56, 256>}, {pipeline_mode = #tpu.pipeline_mode<synchronous>, transform_indices = @transform_3, window_bounds = array<i64: 32, 128>}, {pipeline_mode = #tpu.pipeline_mode<synchronous>, transform_indices = @transform_4, window_bounds = array<i64: 1, 128>}, {pipeline_mode = #tpu.pipeline_mode<synchronous>, transform_indices = @transform_5, window_bounds = array<i64: 32, 128>}, {pipeline_mode = #tpu.pipeline_mode<synchronous>, transform_indices = @transform_6, window_bounds = array<i64: 32, 128>}, {pipeline_mode = #tpu.pipeline_mode<synchronous>, transform_indices = @transform_7, window_bounds = array<i64: 1, 128>}, {transform_indices = @transform_8, window_bounds = array<i64: 1, 128, 128>}]} {
    %c0 = arith.constant 0 : index
    %c0_0 = arith.constant 0 : index
    %c0_1 = arith.constant 0 : index
    %0 = vector.load %arg2[%c0, %c0_0, %c0_1] : memref<1x128x32xf32, #tpu.memory_space<vmem>>, vector<1x128x32xf32>
    %1 = vector.shape_cast %0 : vector<1x128x32xf32> to vector<128x32xf32>
    %c0_2 = arith.constant 0 : index
    %c0_3 = arith.constant 0 : index
    %2 = vector.load %arg3[%c0_2, %c0_3] : memref<128x56xf32, #tpu.memory_space<vmem>>, vector<128x56xf32>
    %c0_4 = arith.constant 0 : index
    %c0_5 = arith.constant 0 : index
    %c0_6 = arith.constant 0 : index
    %3 = vector.load %arg4[%c0_4, %c0_5, %c0_6] : memref<1x56x256xf32, #tpu.memory_space<vmem>>, vector<1x56x256xf32>
    %4 = vector.shape_cast %3 : vector<1x56x256xf32> to vector<56x256xf32>
    %c0_7 = arith.constant 0 : index
    %c0_8 = arith.constant 0 : index
    %5 = vector.load %arg8[%c0_7, %c0_8] : memref<32x128xf32, #tpu.memory_space<vmem>>, vector<32x128xf32>
    %cst = arith.constant dense<0.000000e+00> : vector<128x128xf32>
    %6 = tpu.matmul %1, %5, %cst {dimension_numbers = #tpu.dot_dimension_numbers<[1], [0], [0], [1], [0, 0, 1, 1], [], []>} : vector<128x32xf32>, vector<32x128xf32>, vector<128x128xf32> -> vector<128x128xf32>
    %cst_9 = arith.constant dense<0.000000e+00> : vector<128x256xf32>
    %7 = tpu.matmul %2, %4, %cst_9 {dimension_numbers = #tpu.dot_dimension_numbers<[1], [0], [0], [1], [0, 0, 1, 1], [], []>} : vector<128x56xf32>, vector<56x256xf32>, vector<128x256xf32> -> vector<128x256xf32>
    %8 = vector.extract_strided_slice %7 {offsets = [0, 0], sizes = [128, 128], strides = [1, 1]} : vector<128x256xf32> to vector<128x128xf32>
    %9 = vector.extract_strided_slice %7 {offsets = [0, 128], sizes = [128, 128], strides = [1, 1]} : vector<128x256xf32> to vector<128x128xf32>
    %c0_10 = arith.constant 0 : index
    %c0_11 = arith.constant 0 : index
    %10 = vector.load %arg5[%c0_10, %c0_11] : memref<32x128xf32, #tpu.memory_space<vmem>>, vector<32x128xf32>
    %cst_12 = arith.constant dense<0.000000e+00> : vector<128x128xf32>
    %11 = tpu.matmul %1, %10, %cst_12 {dimension_numbers = #tpu.dot_dimension_numbers<[1], [0], [0], [1], [0, 0, 1, 1], [], []>} : vector<128x32xf32>, vector<32x128xf32>, vector<128x128xf32> -> vector<128x128xf32>
    %12 = arith.addf %9, %11 : vector<128x128xf32>
    %c0_13 = arith.constant 0 : index
    %c0_14 = arith.constant 0 : index
    %13 = vector.load %arg6[%c0_13, %c0_14] : memref<1x128xf32, #tpu.memory_space<vmem>>, vector<1x128xf32>
    %14 = vector.broadcast %13 : vector<1x128xf32> to vector<128x128xf32>
    %15 = arith.addf %12, %14 : vector<128x128xf32>
    %16 = arith.negf %15 : vector<128x128xf32>
    %17 = math.exp %16 : vector<128x128xf32>
    %cst_15 = arith.constant 1.000000e+00 : f32
    %18 = vector.broadcast %cst_15 : f32 to vector<128x128xf32>
    %19 = arith.addf %18, %17 : vector<128x128xf32>
    %20 = arith.divf %18, %19 : vector<128x128xf32>
    %21 = vector.extract_strided_slice %8 {offsets = [0, 0], sizes = [128, 32], strides = [1, 1]} : vector<128x128xf32> to vector<128x32xf32>
    %22 = vector.extract_strided_slice %20 {offsets = [0, 0], sizes = [128, 32], strides = [1, 1]} : vector<128x128xf32> to vector<128x32xf32>
    %23 = arith.mulf %21, %22 : vector<128x32xf32>
    %24 = vector.extract_strided_slice %20 {offsets = [0, 0], sizes = [128, 32], strides = [1, 1]} : vector<128x128xf32> to vector<128x32xf32>
    %25 = vector.extract_strided_slice %8 {offsets = [0, 32], sizes = [128, 32], strides = [1, 1]} : vector<128x128xf32> to vector<128x32xf32>
    %26 = vector.extract_strided_slice %20 {offsets = [0, 32], sizes = [128, 32], strides = [1, 1]} : vector<128x128xf32> to vector<128x32xf32>
    %27 = arith.mulf %25, %26 : vector<128x32xf32>
    %28 = arith.addf %23, %27 : vector<128x32xf32>
    %29 = vector.extract_strided_slice %20 {offsets = [0, 32], sizes = [128, 32], strides = [1, 1]} : vector<128x128xf32> to vector<128x32xf32>
    %30 = arith.addf %24, %29 : vector<128x32xf32>
    %31 = vector.extract_strided_slice %8 {offsets = [0, 64], sizes = [128, 32], strides = [1, 1]} : vector<128x128xf32> to vector<128x32xf32>
    %32 = vector.extract_strided_slice %20 {offsets = [0, 64], sizes = [128, 32], strides = [1, 1]} : vector<128x128xf32> to vector<128x32xf32>
    %33 = arith.mulf %31, %32 : vector<128x32xf32>
    %34 = arith.addf %28, %33 : vector<128x32xf32>
    %35 = vector.extract_strided_slice %20 {offsets = [0, 64], sizes = [128, 32], strides = [1, 1]} : vector<128x128xf32> to vector<128x32xf32>
    %36 = arith.addf %30, %35 : vector<128x32xf32>
    %37 = vector.extract_strided_slice %8 {offsets = [0, 96], sizes = [128, 32], strides = [1, 1]} : vector<128x128xf32> to vector<128x32xf32>
    %38 = vector.extract_strided_slice %20 {offsets = [0, 96], sizes = [128, 32], strides = [1, 1]} : vector<128x128xf32> to vector<128x32xf32>
    %39 = arith.mulf %37, %38 : vector<128x32xf32>
    %40 = arith.addf %34, %39 : vector<128x32xf32>
    %41 = vector.extract_strided_slice %20 {offsets = [0, 96], sizes = [128, 32], strides = [1, 1]} : vector<128x128xf32> to vector<128x32xf32>
    %42 = arith.addf %36, %41 : vector<128x32xf32>
    %43 = tpu.reciprocal %42 : vector<128x32xf32> -> vector<128x32xf32>
    %44 = arith.mulf %40, %43 : vector<128x32xf32>
    %c0_16 = arith.constant 0 : index
    %c0_17 = arith.constant 0 : index
    %45 = vector.load %arg7[%c0_16, %c0_17] : memref<32x128xf32, #tpu.memory_space<vmem>>, vector<32x128xf32>
    %cst_18 = arith.constant dense<0.000000e+00> : vector<128x128xf32>
    %46 = tpu.matmul %44, %45, %cst_18 {dimension_numbers = #tpu.dot_dimension_numbers<[1], [0], [0], [1], [0, 0, 1, 1], [], []>} : vector<128x32xf32>, vector<32x128xf32>, vector<128x128xf32> -> vector<128x128xf32>
    %47 = arith.addf %6, %46 : vector<128x128xf32>
    %c0_19 = arith.constant 0 : index
    %c0_20 = arith.constant 0 : index
    %48 = vector.load %arg9[%c0_19, %c0_20] : memref<1x128xf32, #tpu.memory_space<vmem>>, vector<1x128xf32>
    %49 = vector.broadcast %48 : vector<1x128xf32> to vector<128x128xf32>
    %50 = arith.addf %47, %49 : vector<128x128xf32>
    %cst_21 = arith.constant 0.000000e+00 : f32
    %51 = vector.broadcast %cst_21 : f32 to vector<128x128xf32>
    %52 = arith.maximumf %50, %51 : vector<128x128xf32>
    %c0_22 = arith.constant 0 : index
    %c0_23 = arith.constant 0 : index
    %c0_24 = arith.constant 0 : index
    %53 = vector.load %arg10[%c0_22, %c0_23, %c0_24] : memref<1x128x128xf32, #tpu.memory_space<vmem>>, vector<1x128x128xf32>
    %54 = vector.shape_cast %53 : vector<1x128x128xf32> to vector<128x128xf32>
    %55 = vector.shape_cast %52 : vector<128x128xf32> to vector<1x128x128xf32>
    tpu.vector_store %arg10[%c0_22, %c0_23, %c0_24], %55 {strides = array<i32>} : memref<1x128x128xf32, #tpu.memory_space<vmem>>, vector<1x128x128xf32>,
    return
  }
  func.func @transform_0(%arg0: i32, %arg1: i32) -> (i32, i32, i32) {
    %c0_i32 = arith.constant 0 : i32
    %c0_i32_0 = arith.constant 0 : i32
    return %arg1, %arg0, %c0_i32 : i32, i32, i32
  }
  func.func @transform_1(%arg0: i32, %arg1: i32) -> (i32, i32) {
    %c0_i32 = arith.constant 0 : i32
    %c0_i32_0 = arith.constant 0 : i32
    return %arg0, %c0_i32 : i32, i32
  }
  func.func @transform_2(%arg0: i32, %arg1: i32) -> (i32, i32, i32) {
    %c0_i32 = arith.constant 0 : i32
    %c0_i32_0 = arith.constant 0 : i32
    %c0_i32_1 = arith.constant 0 : i32
    return %arg1, %c0_i32, %c0_i32_0 : i32, i32, i32
  }
  func.func @transform_3(%arg0: i32, %arg1: i32) -> (i32, i32) {
    %c0_i32 = arith.constant 0 : i32
    %c0_i32_0 = arith.constant 0 : i32
    %c0_i32_1 = arith.constant 0 : i32
    return %c0_i32, %c0_i32_0 : i32, i32
  }
  func.func @transform_4(%arg0: i32, %arg1: i32) -> (i32, i32) {
    %c0_i32 = arith.constant 0 : i32
    %c0_i32_0 = arith.constant 0 : i32
    %c0_i32_1 = arith.constant 0 : i32
    return %c0_i32, %c0_i32_0 : i32, i32
  }
  func.func @transform_5(%arg0: i32, %arg1: i32) -> (i32, i32) {
    %c0_i32 = arith.constant 0 : i32
    %c0_i32_0 = arith.constant 0 : i32
    %c0_i32_1 = arith.constant 0 : i32
    return %c0_i32, %c0_i32_0 : i32, i32
  }
  func.func @transform_6(%arg0: i32, %arg1: i32) -> (i32, i32) {
    %c0_i32 = arith.constant 0 : i32
    %c0_i32_0 = arith.constant 0 : i32
    %c0_i32_1 = arith.constant 0 : i32
    return %c0_i32, %c0_i32_0 : i32, i32
  }
  func.func @transform_7(%arg0: i32, %arg1: i32) -> (i32, i32) {
    %c0_i32 = arith.constant 0 : i32
    %c0_i32_0 = arith.constant 0 : i32
    %c0_i32_1 = arith.constant 0 : i32
    return %c0_i32, %c0_i32_0 : i32, i32
  }
  func.func @transform_8(%arg0: i32, %arg1: i32) -> (i32, i32, i32) {
    %c0_i32 = arith.constant 0 : i32
    %c0_i32_0 = arith.constant 0 : i32
    return %arg1, %arg0, %c0_i32 : i32, i32, i32
  }
}

</mosaic_0001>

<bundles_post_ra>
// kernel: tpu_custom_call.1
= control target key start
LH: loop header
LB: loop body
LE: loop exit
PB: predicated region body
PF: predicated region fallthrough
CT: control target
= control target key end

     0   :  { %s3666_s0 = inlined_call_operand.vmem [shape: f32[2,256,32], index: 0, kind: input, shape index: {}]   ;;  %s3667_s1 = inlined_call_operand.vmem [shape: f32[256,56], index: 1, kind: input, shape index: {}]   ;;  %s3668_s2 = inlined_call_operand.vmem [shape: f32[2,56,256], index: 2, kind: input, shape index: {}]   ;;  %s3669_s3 = inlined_call_operand.vmem [shape: f32[32,128], index: 3, kind: input, shape index: {}]   ;;  %s3670_s4 = inlined_call_operand.vmem [shape: f32[1,128], index: 4, kind: input, shape index: {}]   ;;  %s3671_s5 = inlined_call_operand.vmem [shape: f32[32,128], index: 5, kind: input, shape index: {}]   ;;  %s3672_s6 = inlined_call_operand.vmem [shape: f32[32,128], index: 6, kind: input, shape index: {}]   ;;  %s3673_s7 = inlined_call_operand.vmem [shape: f32[1,128], index: 7, kind: input, shape index: {}]   ;;  %s3674_s8 = inlined_call_operand.hbm [shape: f32[2,256,128], index: 8, kind: output, shape index: {}]  }
   0x1   :  { %3679 = sst [smem:[#allocation5_spill]] %s3667_s1 }
   0x2   :  { %13 = vsyncpa [#allocation3], 0 }
   0x3   :  { %15 = vsyncpa [#allocation3 + $0x1], 0  ;;  %s2560_s27 = smov 0   ;;  %s2562_s28 = smov 0  }
   0x4   :  { %s2564_s29 = smov 0   ;;  %s2566_s30 = smov 0  }
   0x5   :  { %s2568_s9 = smov 0   ;;  %s2570_s10 = smov 0  }
   0x6   :  { %s2572_s11 = smov 0   ;;  %s2574_s12 = smov 0  }
   0x7 LB: > { %s2094_s13 = sadd.s32 4294967295, %s2508_s12   ;;  %s2095_s14 = sadd.s32 4294967294, %s2508_s12   ;;  %s2508_s12 = sphi %s2574_s12, %s21_s12   ;;  %s2504_s11 = sphi %s2572_s11, %s3699_s11   ;;  %s2500_s10 = sphi %s2570_s10, %s3698_s10   ;;  %s2496_s9 = sphi %s2568_s9, %s3697_s9   ;;  %s2492_s30 = sphi %s2566_s30, %s3696_s30   ;;  %s2488_s29 = sphi %s2564_s29, %s3695_s29   ;;  %s2484_s28 = sphi %s2562_s28, %s3694_s28   ;;  %s2480_s27 = sphi %s2560_s27, %s3693_s27  }
   0x8   : > { %s30_s15 = sadd.s32 1, %s2500_s10  ;;  %s33_s16 = sadd.s32 1, %s2504_s11 }
   0x9   : > { %p31_p0 = scmp.ge.s32.totalorder %s30_s15, 2  ;;  %p237_p1 = scmp.ne.s32.totalorder %s2488_s29, %s2484_s28 }
   0xa   : > { %p238_p2 = scmp.eq.s32.totalorder %s2094_s13, 3  ;;  %p243_p5 = scmp.ne.s32.totalorder %s2484_s28, %s2480_s27 }
   0xb   : > { %s3701_s15 = smov (%p31_p0, %s30_s15), 0  ;;  %s3703_s16 = smov (!%p31_p0, %s33_s16), %s2504_s11 }
   0xc   : > { %s222_s17 = ssub.s32 %s2500_s10, %s3701_s15  ;;  %p2611_p3 = por %p238_p2, %p237_p1 }
   0xd   : > { %p35_p4 = scmp.ge.s32.totalorder %s3703_s16, 2  ;;  %p244_p6 = scmp.eq.s32.totalorder %s2095_s14, 3 }
   0xe   : > { %p2098_p7 = scmp.ge.s32.totalorder %s2508_s12, 1  ;;  %p307_p9 = scmp.lt.s32.totalorder %s2508_s12, 5 }
   0xf   : > { %s3705_s16 = smov (%p35_p4, %s3703_s16), 0  ;;  %p2620_p8 = por %p244_p6, %p243_p5 }
  0x10   : > { %s223_s20 = ssub.s32 %s2504_s11, %s3705_s16  ;;  %s227_s21 = sadd.s32 1, %s2488_s29 }
  0x11   : > { %s224_s22 = sor.u32 %s223_s20, %s222_s17  ;;  %p308_p10 = pnand %p2098_p7, %p307_p9 }
  0x12   : > { %p225_p11 = scmp.eq.s32.totalorder %s224_s22, 0  ;;  %p356_p12 = scmp.lt.s32.totalorder (!%p308_p10), %s2492_s30, 1 }
  0x13   : > { %311 = sbr.rel (%p308_p10) target bundleno = 779 (0x30b), region = 52  ;;  %s2633_s24 = sshll.u32 (!%p308_p10), %s2496_s9, 4 }
  0x14   : > { %s2629_s23 = scalar_select %p225_p11, %s2488_s29, %s227_s21  }
  0x15   : > { %p358_p13 = scmp.lt.s32.totalorder (!%p308_p10), %s2633_s24, 31  ;;  %s3682_s1 = sld [smem:[#allocation5_spill]] (!%p308_p10) }
  0x16   : > { %s3675_s13 = smov (!%p308_p10), 64   ;;  %s3687_s17 = smov (!%p308_p10), 32  }
  0x17   : > { %s3688_s20 = smov (!%p308_p10), 64  }
  0x18   : > { %s2636_s25 = scalar_select %p356_p12, %s2492_s30, 1  ;;  %v609_v0 = vld [vmem:[%s3669_s3 + $0x18] sm:$0xff]  ;;  %vm427_vm0 = vcmask 457728   ;;  %v608_v18 = vld [vmem:[%s3669_s3 + $0x10] sm:$0xff]  ;;  %v607_v21 = vld [vmem:[%s3669_s3 + $0x8] sm:$0xff]  ;;  %vm610_vm1 = vcmask 261120  }
  0x19   : > { %2215 = vmatpush.msra.mxu2 %v609_v0  ;;  %2216 = vmatpush.msra.mxu3 %v609_v0  ;;  %s2651_s9 = scalar_select %p358_p13, %s2633_s24, 31  ;;  %v606_v23 = vld [vmem:[%s3669_s3] sm:$0xff] }
  0x1a   : > { %s2223_s26 = smul.u32 112, %s2636_s25 }
  0x1b   : > { %s2104_s22 = sshll.u32 %s2651_s9, 3  ;;  %2217 = vmatpush.msra.mxu2 %v608_v18  ;;  %2218 = vmatpush.msra.mxu3 %v608_v18 }
  0x1c   : > { %s2646_s21 = scalar_lea.vmem %s3668_s2, %s2223_s26  ;;  %s2660_s14 = scalar_lea.vmem %s3682_s1, %s2104_s22 }
  0x1d   : > { %v421_v1 = vld [vmem:[%s2646_s21 + $0x60] sm:$0xff]  ;;  %v419_v2 = vld [vmem:[%s2646_s21 + $0x50] sm:$0xff]  ;;  %v422_v10 = vld [vmem:[%s2646_s21 + $0x68] sm:$0xff]  ;;  %s2101_s22 = sshll.u32 %s2636_s25, 5  ;;  %2219 = vmatpush.msra.mxu2 %v607_v21  ;;  %2220 = vmatpush.msra.mxu3 %v607_v21 }
  0x1e   : > { %485 = vmatpush.msra.mxu0 %v421_v1  ;;  %2208 = vmatpush.msra.mxu1 %v421_v1  ;;  %v417_v3 = vld [vmem:[%s2646_s21 + $0x40] sm:$0xff]  ;;  %v415_v4 = vld [vmem:[%s2646_s21 + $0x30] sm:$0xff]  ;;  %v420_v11 = vld [vmem:[%s2646_s21 + $0x58] sm:$0xff]  ;;  %s361_s26 = sadd.s32 %s2101_s22, %s2651_s9 }
  0x1f   : > { %v413_v5 = vld [vmem:[%s2646_s21 + $0x20] sm:$0xff]  ;;  %v411_v6 = vld [vmem:[%s2646_s21 + $0x10] sm:$0xff]  ;;  %v418_v12 = vld [vmem:[%s2646_s21 + $0x48] sm:$0xff]  ;;  %2221 = vmatpush.msra.mxu2 %v606_v23  ;;  %2222 = vmatpush.msra.mxu3 %v606_v23 }
  0x20   : > { %486 = vmatpush.msra.mxu0 %v419_v2  ;;  %2209 = vmatpush.msra.mxu1 %v419_v2  ;;  %v409_v7 = vld [vmem:[%s2646_s21] sm:$0xff]  ;;  %v2666_v9 = vld [vmem:[%s2660_s14 + $0x70] sm:$0xff]  ;;  %v416_v13 = vld [vmem:[%s2646_s21 + $0x38] sm:$0xff] }
  0x21   : > { %v393_v8 = vld [vmem:[%s2660_s14] sm:$0xff]  ;;  %v394_v14 = vld [vmem:[%s2660_s14 + $0x8] sm:$0xff]  ;;  %v2677_v15 = vld [vmem:[%s2660_s14 + $0x78] sm:$0xff] }
  0x22   : > { %487 = vmatpush.msra.mxu0 %v417_v3  ;;  %2210 = vmatpush.msra.mxu1 %v417_v3  ;;  %v414_v16 = vld [vmem:[%s2646_s21 + $0x28] sm:$0xff]  ;;  %v412_v17 = vld [vmem:[%s2646_s21 + $0x18] sm:$0xff]  ;;  %v395_v20 = vld [vmem:[%s2660_s14 + $0x10] sm:$0xff] }
  0x23   : > { %v410_v19 = vld [vmem:[%s2646_s21 + $0x8] sm:$0xff]  ;;  %s2102_s21 = sshll.u32 %s361_s26, 3  ;;  %v396_v22 = vld [vmem:[%s2660_s14 + $0x18] sm:$0xff]  ;;  %v397_v25 = vld [vmem:[%s2660_s14 + $0x20] sm:$0xff]  ;;  %s3677_s26 = smov 32  }
  0x24   : > { %488 = vmatpush.msra.mxu0 %v415_v4  ;;  %2211 = vmatpush.msra.mxu1 %v415_v4  ;;  %s2699_s25 = scalar_lea.vmem %s3666_s0, %s2102_s21  ;;  %v398_v27 = vld [vmem:[%s2660_s14 + $0x28] sm:$0xff]  ;;  %v399_v29 = vld [vmem:[%s2660_s14 + $0x30] sm:$0xff]  ;;  %v400_v31 = vld [vmem:[%s2660_s14 + $0x38] sm:$0xff]  ;;  %s2512_s21 = smov 96  }
  0x25   : > { %v383_v24 = vld [vmem:[%s2699_s25 + $0x30] sm:$0xff]  ;;  %v384_v26 = vld [vmem:[%s2699_s25 + $0x38] sm:$0xff]  ;;  %v385_v28 = vld [vmem:[%s2699_s25 + $0x40] sm:$0xff] }
  0x26   : > { %489 = vmatpush.msra.mxu0 %v413_v5  ;;  %2212 = vmatpush.msra.mxu1 %v413_v5  ;;  %v386_v30 = vld [vmem:[%s2699_s25 + $0x48] sm:$0xff]  ;;  %v387_v32 = vld [vmem:[%s2699_s25 + $0x50] sm:$0xff]  ;;  %v401_v33 = vld [vmem:[%s2660_s14 + $0x40] sm:$0xff] }
  0x27   : > { %2144 = vmatmul.msk.f32.vlgmr.msra.gmra.mxu2 %vm610_vm1, %v383_v24  ;;  %v388_v34 = vld [vmem:[%s2699_s25 + $0x58] sm:$0xff]  ;;  %v402_v35 = vld [vmem:[%s2660_s14 + $0x48] sm:$0xff]  ;;  %v389_v36 = vld [vmem:[%s2699_s25 + $0x60] sm:$0xff] }
  0x28   : > { %490 = vmatpush.msra.mxu0 %v411_v6  ;;  %2213 = vmatpush.msra.mxu1 %v411_v6  ;;  %v403_v37 = vld [vmem:[%s2660_s14 + $0x50] sm:$0xff]  ;;  %v390_v38 = vld [vmem:[%s2699_s25 + $0x68] sm:$0xff]  ;;  %v404_v39 = vld [vmem:[%s2660_s14 + $0x58] sm:$0xff] }
  0x29   : > { %2149 = vmatmul.msk.f32.vlgmr.msra.gmra.mxu3 %vm610_vm1, %v388_v34  ;;  %v391_v40 = vld [vmem:[%s2699_s25 + $0x70] sm:$0xff]  ;;  %v405_v41 = vld [vmem:[%s2660_s14 + $0x60] sm:$0xff]  ;;  %v392_v42 = vld [vmem:[%s2699_s25 + $0x78] sm:$0xff] }
  0x2a   : > { %491 = vmatpush.msra.mxu0 %v409_v7  ;;  %2214 = vmatpush.msra.mxu1 %v409_v7  ;;  %v406_v43 = vld [vmem:[%s2660_s14 + $0x68] sm:$0xff]  ;;  %v377_v44 = vld [vmem:[%s2699_s25] sm:$0xff]  ;;  %v379_v48 = vld [vmem:[%s2699_s25 + $0x10] sm:$0xff] }
  0x2b   : > { %2106 = vmatmul.msk.f32.vlgmr.msra.gmra.mxu0 %vm427_vm0, %v393_v8  ;;  %2120 = vmatmul.msk.f32.vlgmr.msra.gmra.mxu1 %vm427_vm0, %v2666_v9  ;;  %v378_v45 = vld [vmem:[%s2699_s25 + $0x8] sm:$0xff]  ;;  %v380_v51 = vld [vmem:[%s2699_s25 + $0x18] sm:$0xff]  ;;  %v381_v54 = vld [vmem:[%s2699_s25 + $0x20] sm:$0xff] }
  0x2c   : > { %550 = vmatpush.msrb.mxu1 %v422_v10  ;;  %671 = vmatpush.msrb.mxu0 %v609_v0  ;;  %v382_v57 = vld [vmem:[%s2699_s25 + $0x28] sm:$0xff]  ;;  %v2810_v3 = vld [vmem:[%s3670_s4] ss:$0 sm:$0xff] }
  0x2e   : > { %551 = vmatpush.msrb.mxu1 %v420_v11  ;;  %672 = vmatpush.msrb.mxu0 %v608_v18 }
  0x2f   : > { %2145 = vmatmul.msk.f32.gmra.mxu2 %vm610_vm1, %v384_v26 }
  0x30   : > { %552 = vmatpush.msrb.mxu1 %v418_v12  ;;  %673 = vmatpush.msrb.mxu0 %v607_v21 }
  0x31   : > { %2150 = vmatmul.msk.f32.gmra.mxu3 %vm610_vm1, %v389_v36 }
  0x32   : > { %553 = vmatpush.msrb.mxu1 %v416_v13  ;;  %674 = vmatpush.msrb.mxu0 %v606_v23 }
  0x33   : > { %2107 = vmatmul.msk.f32.gmra.mxu0 %vm427_vm0, %v394_v14  ;;  %2121 = vmatmul.msk.f32.gmra.mxu1 %vm427_vm0, %v2677_v15 }
  0x34   : > { %554 = vmatpush.msrb.mxu1 %v414_v16 }
  0x36   : > { %555 = vmatpush.msrb.mxu1 %v412_v17 }
  0x37   : > { %2146 = vmatmul.msk.f32.gmra.mxu2 %vm610_vm1, %v385_v28 }
  0x38   : > { %556 = vmatpush.msrb.mxu1 %v410_v19 }
  0x39   : > { %2151 = vmatmul.msk.f32.gmra.mxu3 %vm610_vm1, %v390_v38 }
  0x3b   : > { %2108 = vmatmul.msk.f32.gmra.mxu0 %vm427_vm0, %v395_v20  ;;  %2122 = vmatmul.msk.f32.vlgmr.msrb.gmra.mxu1 %vm427_vm0, %v393_v8 }
  0x3f   : > { %2147 = vmatmul.msk.f32.gmra.mxu2 %vm610_vm1, %v386_v30 }
  0x41   : > { %2152 = vmatmul.msk.f32.gmra.mxu3 %vm610_vm1, %v391_v40 }
  0x43   : > { %2109 = vmatmul.msk.f32.gmra.mxu0 %vm427_vm0, %v396_v22  ;;  %2123 = vmatmul.msk.f32.gmra.mxu1 %vm427_vm0, %v394_v14 }
  0x47   : > { %2148 = vmatmul.msk.f32.gmra.mxu2 %vm610_vm1, %v387_v32 }
  0x49   : > { %2153 = vmatmul.msk.f32.gmra.mxu3 %vm610_vm1, %v392_v42 }
  0x4b   : > { %2110 = vmatmul.msk.f32.gmra.mxu0 %vm427_vm0, %v397_v25  ;;  %2124 = vmatmul.msk.f32.gmra.mxu1 %vm427_vm0, %v395_v20 }
  0x53   : > { %2111 = vmatmul.msk.f32.gmra.mxu0 %vm427_vm0, %v398_v27  ;;  %2125 = vmatmul.msk.f32.gmra.mxu1 %vm427_vm0, %v396_v22 }
  0x5b   : > { %2112 = vmatmul.msk.f32.gmra.mxu0 %vm427_vm0, %v399_v29  ;;  %2126 = vmatmul.msk.f32.gmra.mxu1 %vm427_vm0, %v397_v25 }
  0x63   : > { %2113 = vmatmul.msk.f32.gmra.mxu0 %vm427_vm0, %v400_v31  ;;  %2127 = vmatmul.msk.f32.gmra.mxu1 %vm427_vm0, %v398_v27 }
  0x6b   : > { %2114 = vmatmul.msk.f32.gmra.mxu0 %vm427_vm0, %v401_v33  ;;  %2128 = vmatmul.msk.f32.gmra.mxu1 %vm427_vm0, %v399_v29 }
  0x73   : > { %2115 = vmatmul.msk.f32.gmra.mxu0 %vm427_vm0, %v402_v35  ;;  %2129 = vmatmul.msk.f32.gmra.mxu1 %vm427_vm0, %v400_v31 }
  0x7b   : > { %2116 = vmatmul.msk.f32.gmra.mxu0 %vm427_vm0, %v403_v37  ;;  %2130 = vmatmul.msk.f32.gmra.mxu1 %vm427_vm0, %v401_v33 }
  0x83   : > { %2117 = vmatmul.msk.f32.gmra.mxu0 %vm427_vm0, %v404_v39  ;;  %2131 = vmatmul.msk.f32.gmra.mxu1 %vm427_vm0, %v402_v35 }
  0x8b   : > { %2118 = vmatmul.msk.f32.gmra.mxu0 %vm427_vm0, %v405_v41  ;;  %2132 = vmatmul.msk.f32.gmra.mxu1 %vm427_vm0, %v403_v37 }
  0x93   : > { %2119 = vmatmul.msk.f32.gmra.mxu0 %vm427_vm0, %v406_v43  ;;  %2133 = vmatmul.msk.f32.gmra.mxu1 %vm427_vm0, %v404_v39 }
  0x9b   : > { %2134 = vmatmul.msk.f32.gmra.mxu1 %vm427_vm0, %v405_v41  ;;  %2138 = vmatmul.msk.f32.vlgmr.msrb.gmra.mxu0 %vm610_vm1, %v377_v44 }
  0xa3   : > { %2135 = vmatmul.msk.f32.gmra.mxu1 %vm427_vm0, %v406_v43  ;;  %2139 = vmatmul.msk.f32.gmra.mxu0 %vm610_vm1, %v378_v45 }
  0xa8   : > { %v2763_v46 = vpop.f32.mrf.mxu0  ;;  %v2765_v47 = vpop.f32.mrf.mxu1 }
  0xaa   : > { %v694_v0 = vpop.f32.mrf.mxu2 }
  0xab   : > { %2136 = vmatmul.msk.f32.gmra.mxu1 %vm427_vm0, %v2666_v9  ;;  %2140 = vmatmul.msk.f32.gmra.mxu0 %vm610_vm1, %v379_v48 }
  0xb0   : > { %v2771_v49 = vpop.f32.mrf.mxu0  ;;  %v2773_v50 = vpop.f32.mrf.mxu1 }
  0xb2   : > { %v697_v7 = vpop.f32.mrf.mxu2 }
  0xb3   : > { %2137 = vmatmul.msk.f32.gmra.mxu1 %vm427_vm0, %v2677_v15  ;;  %2141 = vmatmul.msk.f32.gmra.mxu0 %vm610_vm1, %v380_v51 }
  0xb8   : > { %v2779_v52 = vpop.f32.mrf.mxu0  ;;  %v2781_v53 = vpop.f32.mrf.mxu1 }
  0xba   : > { %v700_v14 = vpop.f32.mrf.mxu2 }
  0xbb   : > { %2142 = vmatmul.msk.f32.gmra.mxu0 %vm610_vm1, %v381_v54 }
  0xc0   : > { %v2785_v55 = vpop.f32.mrf.mxu0  ;;  %v2787_v56 = vpop.f32.mrf.mxu1 }
  0xc2   : > { %v703_v24 = vpop.f32.mrf.mxu2 }
  0xc3   : > { %2143 = vmatmul.msk.f32.gmra.mxu0 %vm610_vm1, %v382_v57 }
  0xc8   : > { %v2791_v58 = vpop.f32.mrf.mxu0  ;;  %v2793_v59 = vpop.f32.mrf.mxu1 }
  0xca   : > { %v706_v40 = vpop.f32.mrf.mxu2 }
  0xd0   : > { %v2795_v60 = vpop.f32.mrf.mxu0  ;;  %v2797_v61 = vpop.f32.mrf.mxu1 }
  0xd8   : > { %v2799_v62 = vpop.f32.mrf.mxu0  ;;  %v2801_v63 = vpop.f32.mrf.mxu1 }
  0xe0   : > { %v2803_v1 = vpop.f32.mrf.mxu0  ;;  %v2805_v2 = vpop.f32.mrf.mxu1 }
  0xe8   : > { %v2812_v4 = vpop.f32.mrf.mxu0  ;;  %v576_v5 = vpop.f32.mrf.mxu1 }
  0xe9   : > { %v730_v6 = vadd.f32 %v694_v0, %v576_v5 }
  0xeb   : > { %v750_v8 = vadd.f32 %v2810_v3, %v730_v6 }
  0xed   : > { %v2160_v9 = vmul.f32 -1.442695, %v750_v8 }
  0xef   : > { %2302 = vpow2.f32 %v2160_v9 }
  0xf0   : > { %v2815_v10 = vpop.f32.mrf.mxu0  ;;  %v579_v11 = vpop.f32.mrf.mxu1 }
  0xf1   : > { %v731_v12 = vadd.f32 %v697_v7, %v579_v11 }
  0xf3   : > { %v751_v13 = vadd.f32 %v2810_v3, %v731_v12 }
  0xf5   : > { %v2303_v15 = vpop.eup %2302  ;;  %v2161_v16 = vmul.f32 -1.442695, %v751_v13 }
  0xf6   : > { %v814_v17 = vadd.f32 1.0, %v2303_v15 }
  0xf7   : > { %2304 = vpow2.f32 %v2161_v16 }
  0xf8   : > { %2306 = vrcp.f32 %v814_v17  ;;  %v2818_v18 = vpop.f32.mrf.mxu0  ;;  %v582_v19 = vpop.f32.mrf.mxu1  ;;  %v925_v31 = vand.u32 2147483648, %v814_v17  ;;  %v923_v34 = vand.u32 2147483647, %v814_v17  ;;  %vm919_vm3 = vweird.f32 %v814_v17 }
  0xf9   : > { %v732_v20 = vadd.f32 %v700_v14, %v582_v19 }
  0xfa   : > { %v926_v38 = vor.u32 1.1754944e-38, %v925_v31  ;;  %vm924_vm5 = vcmp.eq.f32.partialorder %v923_v34, 8.507059e+37 }
  0xfb   : > { %v752_v21 = vadd.f32 %v2810_v3, %v732_v20 }
  0xfd   : > { %v2305_v22 = vpop.eup %2304  ;;  %v2162_v23 = vmul.f32 -1.442695, %v752_v21 }
  0xfe   : > { %v2307_v25 = vpop.eup %2306  ;;  %v815_v26 = vadd.f32 1.0, %v2305_v22 }
  0xff   : > { %2308 = vpow2.f32 %v2162_v23  ;;  %v915_v27 = vmul.f32 %v2307_v25, %v814_v17  ;;  %vm920_vm2 = vweird.f32 %v2307_v25 }
 0x100   : > { %2310 = vrcp.f32 %v815_v26  ;;  %v2821_v28 = vpop.f32.mrf.mxu0  ;;  %v585_v29 = vpop.f32.mrf.mxu1  ;;  %vm921_vm4 = vmor %vm919_vm3, %vm920_vm2  ;;  %vm934_vm6 = vweird.f32 %v815_v26  ;;  %v940_v11 = vand.u32 2147483648, %v815_v26  ;;  %v938_v13 = vand.u32 2147483647, %v815_v26 }
 0x101   : > { %v916_v30 = vsub.f32 1.0, %v915_v27  ;;  %v733_v32 = vadd.f32 %v703_v24, %v585_v29 }
 0x102   : > { %v941_v16 = vor.u32 1.1754944e-38, %v940_v11  ;;  %vm939_vm9 = vcmp.eq.f32.partialorder %v938_v13, 8.507059e+37 }
 0x103   : > { %v917_v33 = vmul.f32 %v2307_v25, %v916_v30  ;;  %v753_v39 = vadd.f32 %v2810_v3, %v733_v32 }
 0x105   : > { %v2309_v35 = vpop.eup %2308  ;;  %v918_v36 = vadd.f32 %v2307_v25, %v917_v33  ;;  %v2163_v54 = vmul.f32 -1.442695, %v753_v39 }
 0x106   : > { %v2311_v37 = vpop.eup %2310  ;;  %v2824_v43 = vadd.f32 1.0, %v2309_v35 }
 0x107   : > { %v922_v41 = vsel %vm921_vm4, %v2307_v25, %v918_v36  ;;  %v930_v42 = vmul.f32 %v2311_v37, %v815_v26  ;;  %vm935_vm7 = vweird.f32 %v2311_v37 }
 0x108   : > { %v2826_v44 = vpop.f32.mrf.mxu0  ;;  %v588_v45 = vpop.f32.mrf.mxu1  ;;  %v2828_v48 = vsel %vm924_vm5, %v926_v38, %v922_v41  ;;  %2312 = vrcp.f32 %v2824_v43  ;;  %vm936_vm8 = vmor %vm934_vm6, %vm935_vm7  ;;  %vm949_vm10 = vweird.f32 %v2824_v43  ;;  %v955_v30 = vand.u32 2147483648, %v2824_v43 }
 0x109   : > { %1444 = vrot.lane.b32.xlu1 %v2828_v48, %s3677_s26  ;;  %1316 = vrot.lane.b32.xlu2 %v2828_v48, %s3675_s13  ;;  %v931_v51 = vsub.f32 1.0, %v930_v42  ;;  %v734_v57 = vadd.f32 %v706_v40, %v588_v45  ;;  %2314 = vpow2.f32 %v2163_v54  ;;  %v2840_v6 = vmul.f32 %v2828_v48, %v2799_v62 }
 0x10a   : > { %1188 = vrot.lane.b32.xlu0 %v2828_v48, %s2512_s21  ;;  %v956_v35 = vor.u32 1.1754944e-38, %v955_v30 }
 0x10b   : > { %v932_v0 = vmul.f32 %v2311_v37, %v931_v51  ;;  %v754_v5 = vadd.f32 %v2810_v3, %v734_v57 }
 0x10d   : > { %v933_v8 = vadd.f32 %v2311_v37, %v932_v0  ;;  %v2164_v12 = vmul.f32 -1.442695, %v754_v5 }
 0x10e   : > { %v2313_v9 = vpop.eup %2312 }
 0x10f   : > { %v2315_v62 = vpop.eup %2314  ;;  %v937_v14 = vsel %vm936_vm8, %v2311_v37, %v933_v8  ;;  %v945_v15 = vmul.f32 %v2313_v9, %v2824_v43  ;;  %2316 = vpow2.f32 %v2164_v12  ;;  %vm950_vm11 = vweird.f32 %v2313_v9 }
 0x110   : > { %v2842_v7 = vpop.f32.mrf.mxu0  ;;  %v2851_v17 = vadd.f32 1.0, %v2315_v62  ;;  %v2853_v20 = vsel %vm939_vm9, %v941_v16, %v937_v14  ;;  %vm951_vm12 = vmor %vm949_vm10, %vm950_vm11 }
 0x111   : > { %1380 = vrot.lane.b32.xlu2 %v2840_v6, %s3677_s26  ;;  %1108 = vrot.lane.b32.xlu1 %v2840_v6, %s2512_s21  ;;  %v946_v22 = vsub.f32 1.0, %v945_v15 }
 0x112   : > { %1252 = vrot.lane.b32.xlu0 %v2840_v6, %s3675_s13  ;;  %2318 = vrcp.f32 %v2851_v17  ;;  %vm964_vm14 = vweird.f32 %v2851_v17  ;;  %v970_v8 = vand.u32 2147483648, %v2851_v17  ;;  %v968_v11 = vand.u32 2147483647, %v2851_v17 }
 0x113   : > { %v947_v26 = vmul.f32 %v2313_v9, %v946_v22 }
 0x114   : > { %v971_v62 = vor.u32 1.1754944e-38, %v970_v8  ;;  %vm969_vm2 = vcmp.eq.f32.partialorder %v968_v11, 8.507059e+37 }
 0x115   : > { %v2317_v24 = vpop.eup %2316  ;;  %v948_v32 = vadd.f32 %v2313_v9, %v947_v26 }
 0x116   : > { %v2869_v27 = vadd.f32 1.0, %v2317_v24 }
 0x117   : > { %v952_v37 = vsel %vm951_vm12, %v2313_v9, %v948_v32 }
 0x118   : > { %v676_v19 = vpop.f32.mrf.mxu0  ;;  %v2319_v33 = vpop.eup %2318  ;;  %vm979_vm3 = vweird.f32 %v2869_v27  ;;  %v985_v22 = vand.u32 2147483648, %v2869_v27 }
 0x119   : > { %v724_v21 = vadd.f32 %v676_v19, %v2781_v53  ;;  %1446 = vrot.lane.b32.xlu1 %v2853_v20, %s3677_s26  ;;  %1318 = vrot.lane.b32.xlu2 %v2853_v20, %s3675_s13  ;;  %v2866_v53 = vmul.f32 %v2853_v20, %v2803_v1  ;;  %v953_v1 = vand.u32 2147483647, %v2824_v43  ;;  %v960_v38 = vmul.f32 %v2319_v33, %v2851_v17 }
 0x11a   : > { %1190 = vrot.lane.b32.xlu0 %v2853_v20, %s2512_s21  ;;  %vm965_vm15 = vweird.f32 %v2319_v33  ;;  %v986_v26 = vor.u32 1.1754944e-38, %v985_v22 }
 0x11b   : > { %v744_v23 = vadd.f32 %v2810_v3, %v724_v21  ;;  %vm954_vm13 = vcmp.eq.f32.partialorder %v953_v1, 8.507059e+37  ;;  %v961_v41 = vsub.f32 1.0, %v960_v38  ;;  %vm966_vm0 = vmor %vm964_vm14, %vm965_vm15  ;;  %v983_v21 = vand.u32 2147483647, %v2869_v27 }
 0x11c   : > { %v2886_v40 = vsel %vm954_vm13, %v956_v35, %v952_v37 }
 0x11d   : > { %v2154_v25 = vmul.f32 -1.442695, %v744_v23  ;;  %v962_v45 = vmul.f32 %v2319_v33, %v961_v41  ;;  %v2897_v57 = vmul.f32 %v2886_v40, %v2812_v4  ;;  %vm984_vm6 = vcmp.eq.f32.partialorder %v983_v21, 8.507059e+37 }
 0x11f   : > { %2320 = vpow2.f32 %v2154_v25  ;;  %v963_v9 = vadd.f32 %v2319_v33, %v962_v45 }
 0x120   : > { %v679_v29 = vpop.f32.mrf.mxu0  ;;  %2322 = vrcp.f32 %v2869_v27 }
 0x121   : > { %v725_v31 = vadd.f32 %v679_v29, %v2787_v56  ;;  %1382 = vrot.lane.b32.xlu2 %v2866_v53, %s3677_s26  ;;  %1110 = vrot.lane.b32.xlu1 %v2866_v53, %s2512_s21  ;;  %v967_v14 = vsel %vm966_vm0, %v2319_v33, %v963_v9 }
 0x122   : > { %1254 = vrot.lane.b32.xlu0 %v2866_v53, %s3675_s13  ;;  %v2915_v17 = vsel %vm969_vm2, %v971_v62, %v967_v14 }
 0x123   : > { %v745_v34 = vadd.f32 %v2810_v3, %v725_v31 }
 0x125   : > { %v2321_v56 = vpop.eup %2320  ;;  %v2155_v36 = vmul.f32 -1.442695, %v745_v34 }
 0x126   : > { %v2883_v39 = vadd.f32 1.0, %v2321_v56  ;;  %v2323_v42 = vpop.eup %2322 }
 0x127   : > { %2324 = vpow2.f32 %v2155_v36  ;;  %v975_v51 = vmul.f32 %v2323_v42, %v2869_v27  ;;  %vm980_vm4 = vweird.f32 %v2323_v42 }
 0x128   : > { %2326 = vrcp.f32 %v2883_v39  ;;  %v682_v5 = vpop.f32.mrf.mxu0  ;;  %vm981_vm5 = vmor %vm979_vm3, %vm980_vm4  ;;  %v835_v31 = vand.u32 2147483648, %v2883_v39  ;;  %vm829_vm8 = vweird.f32 %v2883_v39  ;;  %v833_v32 = vand.u32 2147483647, %v2883_v39 }
 0x129   : > { %1448 = vrot.lane.b32.xlu1 %v2886_v40, %s3677_s26  ;;  %1320 = vrot.lane.b32.xlu2 %v2886_v40, %s3675_s13  ;;  %v976_v12 = vsub.f32 1.0, %v975_v51  ;;  %v726_v13 = vadd.f32 %v682_v5, %v2793_v59 }
 0x12a   : > { %1192 = vrot.lane.b32.xlu0 %v2886_v40, %s2512_s21  ;;  %v836_v56 = vor.u32 1.1754944e-38, %v835_v31  ;;  %vm834_vm10 = vcmp.eq.f32.partialorder %v833_v32, 8.507059e+37 }
 0x12b   : > { %v977_v15 = vmul.f32 %v2323_v42, %v976_v12  ;;  %v746_v19 = vadd.f32 %v2810_v3, %v726_v13 }
 0x12d   : > { %v2325_v43 = vpop.eup %2324  ;;  %v978_v59 = vadd.f32 %v2323_v42, %v977_v15  ;;  %v2156_v25 = vmul.f32 -1.442695, %v746_v19 }
 0x12e   : > { %v2327_v54 = vpop.eup %2326  ;;  %v2900_v0 = vadd.f32 1.0, %v2325_v43 }
 0x12f   : > { %v825_v4 = vmul.f32 %v2327_v54, %v2883_v39  ;;  %v982_v29 = vsel %vm981_vm5, %v2323_v42, %v978_v59  ;;  %vm830_vm7 = vweird.f32 %v2327_v54 }
 0x130   : > { %2328 = vrcp.f32 %v2900_v0  ;;  %v685_v1 = vpop.f32.mrf.mxu0  ;;  %v2929_v33 = vsel %vm984_vm6, %v986_v26, %v982_v29  ;;  %vm831_vm9 = vmor %vm829_vm8, %vm830_vm7  ;;  %vm844_vm12 = vweird.f32 %v2900_v0 }
 0x131   : > { %1384 = vrot.lane.b32.xlu2 %v2897_v57, %s3677_s26  ;;  %1112 = vrot.lane.b32.xlu1 %v2897_v57, %s2512_s21  ;;  %v826_v16 = vsub.f32 1.0, %v825_v4  ;;  %2330 = vpow2.f32 %v2156_v25  ;;  %v727_v36 = vadd.f32 %v685_v1, %v2797_v61  ;;  %v850_v61 = vand.u32 2147483648, %v2900_v0 }
 0x132   : > { %1256 = vrot.lane.b32.xlu0 %v2897_v57, %s3675_s13 }
 0x133   : > { %v827_v23 = vmul.f32 %v2327_v54, %v826_v16  ;;  %v747_v41 = vadd.f32 %v2810_v3, %v727_v36  ;;  %v851_v5 = vor.u32 1.1754944e-38, %v850_v61 }
 0x135   : > { %v828_v30 = vadd.f32 %v2327_v54, %v827_v23  ;;  %v2157_v51 = vmul.f32 -1.442695, %v747_v41 }
 0x136   : > { %v2329_v24 = vpop.eup %2328 }
 0x137   : > { %v840_v27 = vmul.f32 %v2329_v24, %v2900_v0  ;;  %v832_v34 = vsel %vm831_vm9, %v2327_v54, %v828_v30  ;;  %v2331_v38 = vpop.eup %2330  ;;  %vm845_vm11 = vweird.f32 %v2329_v24  ;;  %v591_v30 = vpop.f32.mrf.mxu1 }
 0x138   : > { %v2938_v37 = vsel %vm834_vm10, %v836_v56, %v832_v34  ;;  %v810_v43 = vadd.f32 1.0, %v2331_v38  ;;  %vm846_vm13 = vmor %vm844_vm12, %vm845_vm11  ;;  %v688_v8 = vpop.f32.mrf.mxu0 }
 0x139   : > { %1450 = vrot.lane.b32.xlu1 %v2915_v17, %s3677_s26  ;;  %1322 = vrot.lane.b32.xlu2 %v2915_v17, %s3675_s13  ;;  %v841_v35 = vsub.f32 1.0, %v840_v27  ;;  %v2943_v42 = vmul.f32 %v2938_v37, %v2763_v46  ;;  %v848_v46 = vand.u32 2147483647, %v2900_v0  ;;  %v728_v0 = vadd.f32 %v688_v8, %v2801_v63  ;;  %v709_v27 = vpop.f32.mrf.mxu3 }
 0x13a   : > { %1194 = vrot.lane.b32.xlu0 %v2915_v17, %s2512_s21  ;;  %2332 = vrcp.f32 %v810_v43  ;;  %v865_v59 = vand.u32 2147483648, %v810_v43  ;;  %vm859_vm0 = vweird.f32 %v810_v43 }
 0x13b   : > { %v842_v39 = vmul.f32 %v2329_v24, %v841_v35  ;;  %2334 = vpow2.f32 %v2157_v51  ;;  %vm849_vm14 = vcmp.eq.f32.partialorder %v848_v46, 8.507059e+37  ;;  %v748_v13 = vadd.f32 %v2810_v3, %v728_v0 }
 0x13c   : > { %v866_v31 = vor.u32 1.1754944e-38, %v865_v59  ;;  %v735_v35 = vadd.f32 %v709_v27, %v591_v30 }
 0x13d   : > { %v843_v45 = vadd.f32 %v2329_v24, %v842_v39  ;;  %v2158_v15 = vmul.f32 -1.442695, %v748_v13 }
 0x13e   : > { %v755_v38 = vadd.f32 %v2810_v3, %v735_v35 }
 0x13f   : > { %v847_v54 = vsel %vm846_vm13, %v2329_v24, %v843_v45 }
 0x140   : > { %v2954_v9 = vsel %vm849_vm14, %v851_v5, %v847_v54  ;;  %v2333_v11 = vpop.eup %2332  ;;  %v691_v19 = vpop.f32.mrf.mxu0 }
 0x141   : > { %1452 = vrot.lane.b32.xlu1 %v2929_v33, %s3677_s26  ;;  %1324 = vrot.lane.b32.xlu2 %v2929_v33, %s3675_s13  ;;  %v2335_v12 = vpop.eup %2334  ;;  %v855_v4 = vmul.f32 %v2333_v11, %v810_v43  ;;  %v2972_v63 = vmul.f32 %v2954_v9, %v2771_v49  ;;  %vm860_vm15 = vweird.f32 %v2333_v11  ;;  %v729_v23 = vadd.f32 %v691_v19, %v2805_v2 }
 0x142   : > { %1196 = vrot.lane.b32.xlu0 %v2929_v33, %s2512_s21  ;;  %v811_v62 = vadd.f32 1.0, %v2335_v12  ;;  %v863_v49 = vand.u32 2147483647, %v810_v43  ;;  %vm861_vm2 = vmor %vm859_vm0, %vm860_vm15  ;;  %v2165_v43 = vmul.f32 -1.442695, %v755_v38 }
 0x143   : > { %v856_v14 = vsub.f32 1.0, %v855_v4  ;;  %v749_v32 = vadd.f32 %v2810_v3, %v729_v23  ;;  %v594_v23 = vpop.f32.mrf.mxu1 }
 0x144   : > { %2336 = vrcp.f32 %v811_v62  ;;  %vm864_vm3 = vcmp.eq.f32.partialorder %v863_v49, 8.507059e+37  ;;  %v880_v51 = vand.u32 2147483648, %v811_v62  ;;  %vm874_vm5 = vweird.f32 %v811_v62  ;;  %v712_v49 = vpop.f32.mrf.mxu3 }
 0x145   : > { %v857_v16 = vmul.f32 %v2333_v11, %v856_v14  ;;  %2338 = vpow2.f32 %v2158_v15  ;;  %v2159_v56 = vmul.f32 -1.442695, %v749_v32  ;;  %v878_v54 = vand.u32 2147483647, %v811_v62 }
 0x147   : > { %v858_v21 = vadd.f32 %v2333_v11, %v857_v16  ;;  %vm879_vm7 = vcmp.eq.f32.partialorder %v878_v54, 8.507059e+37 }
 0x149   : > { %1432 = vrot.lane.b32.xlu1 %v2938_v37, %s3677_s26  ;;  %1368 = vrot.lane.b32.xlu2 %v2943_v42, %s3677_s26  ;;  %v862_v26 = vsel %vm861_vm2, %v2333_v11, %v858_v21  ;;  %v881_v11 = vor.u32 1.1754944e-38, %v880_v51 }
 0x14a   : > { %1176 = vrot.lane.b32.xlu0 %v2938_v37, %s2512_s21  ;;  %v2337_v22 = vpop.eup %2336  ;;  %v2984_v34 = vsel %vm864_vm3, %v866_v31, %v862_v26 }
 0x14b   : > { %v2339_v25 = vpop.eup %2338  ;;  %v870_v29 = vmul.f32 %v2337_v22, %v811_v62  ;;  %v2998_v41 = vmul.f32 %v2984_v34, %v2779_v52  ;;  %vm875_vm4 = vweird.f32 %v2337_v22 }
 0x14c   : > { %v2982_v1 = vadd.f32 1.0, %v2339_v25  ;;  %vm876_vm6 = vmor %vm874_vm5, %vm875_vm4 }
 0x14d   : > { %v871_v2 = vsub.f32 1.0, %v870_v29 }
 0x14e   : > { %2340 = vrcp.f32 %v2982_v1  ;;  %vm889_vm9 = vweird.f32 %v2982_v1  ;;  %v893_v27 = vand.u32 2147483647, %v2982_v1 }
 0x14f   : > { %v872_v39 = vmul.f32 %v2337_v22, %v871_v2  ;;  %2342 = vpow2.f32 %v2159_v56 }
 0x150   : > { %2344 = vpow2.f32 %v2165_v43  ;;  %vm894_vm11 = vcmp.eq.f32.partialorder %v893_v27, 8.507059e+37 }
 0x151   : > { %1096 = vrot.lane.b32.xlu1 %v2943_v42, %s2512_s21  ;;  %1306 = vrot.lane.b32.xlu2 %v2954_v9, %s3675_s13  ;;  %v873_v45 = vadd.f32 %v2337_v22, %v872_v39 }
 0x152   : > { %1304 = vrot.lane.b32.xlu0 %v2938_v37, %s3675_s13 }
 0x153   : > { %v877_v5 = vsel %vm876_vm6, %v2337_v22, %v873_v45 }
 0x154   : > { %v2341_v61 = vpop.eup %2340  ;;  %v3011_v12 = vsel %vm879_vm7, %v881_v11, %v877_v5 }
 0x155   : > { %v2343_v52 = vpop.eup %2342  ;;  %v885_v8 = vmul.f32 %v2341_v61, %v2982_v1  ;;  %v3027_v59 = vmul.f32 %v3011_v12, %v2785_v55  ;;  %vm890_vm8 = vweird.f32 %v2341_v61  ;;  %v895_v55 = vand.u32 2147483648, %v2982_v1 }
 0x156   : > { %v3009_v0 = vadd.f32 1.0, %v2343_v52  ;;  %v2345_v13 = vpop.eup %2344  ;;  %vm891_vm10 = vmor %vm889_vm9, %vm890_vm8 }
 0x157   : > { %v886_v4 = vsub.f32 1.0, %v885_v8  ;;  %v3023_v21 = vadd.f32 1.0, %v2345_v13  ;;  %v896_v38 = vor.u32 1.1754944e-38, %v895_v55 }
 0x158   : > { %2346 = vrcp.f32 %v3009_v0  ;;  %vm904_vm2 = vweird.f32 %v3009_v0 }
 0x159   : > { %1434 = vrot.lane.b32.xlu2 %v2954_v9, %s3677_s26  ;;  %1178 = vrot.lane.b32.xlu1 %v2954_v9, %s2512_s21  ;;  %v887_v19 = vmul.f32 %v2341_v61, %v886_v4  ;;  %2348 = vrcp.f32 %v3023_v21  ;;  %vm994_vm4 = vweird.f32 %v3023_v21 }
 0x15a   : > { %1240 = vrot.lane.b32.xlu0 %v2943_v42, %s3675_s13 }
 0x15b   : > { %v888_v26 = vadd.f32 %v2341_v61, %v887_v19  ;;  %v597_v19 = vpop.f32.mrf.mxu1 }
 0x15d   : > { %v892_v35 = vsel %vm891_vm10, %v2341_v61, %v888_v26 }
 0x15e   : > { %v3053_v51 = vsel %vm894_vm11, %v896_v38, %v892_v35 }
 0x161   : > { %1370 = vrot.lane.b32.xlu2 %v2972_v63, %s3677_s26  ;;  %1098 = vrot.lane.b32.xlu1 %v2972_v63, %s2512_s21 }
 0x162   : > { %1242 = vrot.lane.b32.xlu0 %v2972_v63, %s3675_s13 }
 0x163   : > { %v1317_v24 = vpop.permute.xlu2 %1316 }
 0x169   : > { %1436 = vrot.lane.b32.xlu1 %v2984_v34, %s3677_s26  ;;  %1308 = vrot.lane.b32.xlu2 %v2984_v34, %s3675_s13 }
 0x16a   : > { %1180 = vrot.lane.b32.xlu0 %v2984_v34, %s2512_s21 }
 0x16b   : > { %v2992_v36 = vpop.permute.xlu2 %1380 }
 0x171   : > { %1372 = vrot.lane.b32.xlu2 %v2998_v41, %s3677_s26  ;;  %1100 = vrot.lane.b32.xlu1 %v2998_v41, %s2512_s21 }
 0x172   : > { %1244 = vrot.lane.b32.xlu0 %v2998_v41, %s3675_s13 }
 0x173   : > { %v3006_v46 = vpop.permute.xlu2 %1318 }
 0x179   : > { %1438 = vrot.lane.b32.xlu1 %v3011_v12, %s3677_s26  ;;  %1310 = vrot.lane.b32.xlu2 %v3011_v12, %s3675_s13 }
 0x17a   : > { %1182 = vrot.lane.b32.xlu0 %v3011_v12, %s2512_s21 }
 0x17b   : > { %v1445_v62 = vpop.permute.xlu1 %1444  ;;  %v3019_v14 = vpop.permute.xlu2 %1382 }
 0x17c   : > { %v1189_v15 = vpop.permute.xlu0 %1188 }
 0x17d   : > { %v1230_v16 = vadd.f32 %v1189_v15, %v2828_v48  ;;  %v3035_v48 = vpop.eup %2346 }
 0x17e   : > { %v900_v2 = vmul.f32 %v3035_v48, %v3009_v0  ;;  %v3050_v43 = vpop.eup %2348  ;;  %vm905_vm14 = vweird.f32 %v3035_v48 }
 0x17f   : > { %v1358_v22 = vadd.f32 %v1317_v24, %v1230_v16  ;;  %v736_v24 = vadd.f32 %v712_v49, %v594_v23  ;;  %v990_v8 = vmul.f32 %v3050_v43, %v3023_v21  ;;  %v3073_v49 = vmul.f32 %v3053_v51, %v2791_v58  ;;  %vm906_vm3 = vmor %vm904_vm2, %vm905_vm14 }
 0x180   : > { %vm995_vm6 = vweird.f32 %v3050_v43 }
 0x181   : > { %v3029_v25 = vadd.f32 %v1445_v62, %v1358_v22  ;;  %1374 = vrot.lane.b32.xlu2 %v3027_v59, %s3677_s26  ;;  %1102 = vrot.lane.b32.xlu1 %v3027_v59, %s2512_s21  ;;  %v756_v39 = vadd.f32 %v2810_v3, %v736_v24  ;;  %v715_v22 = vpop.f32.mrf.mxu3  ;;  %v991_v26 = vsub.f32 1.0, %v990_v8  ;;  %vm3123_vm7 = vmor %vm994_vm4, %vm995_vm6 }
 0x182   : > { %1246 = vrot.lane.b32.xlu0 %v3027_v59, %s3675_s13 }
 0x183   : > { %2350 = vrcp.f32 %v3029_v25  ;;  %v1109_v29 = vpop.permute.xlu1 %1108  ;;  %v3042_v30 = vpop.permute.xlu2 %1320  ;;  %v2166_v54 = vmul.f32 -1.442695, %v756_v39  ;;  %v1591_v62 = vand.u32 2147483648, %v3029_v25  ;;  %v1589_v16 = vand.u32 2147483647, %v3029_v25 }
 0x184   : > { %v1253_v31 = vpop.permute.xlu0 %1252  ;;  %v1150_v32 = vadd.f32 %v1109_v29, %v2840_v6  ;;  %v901_v6 = vsub.f32 1.0, %v900_v2  ;;  %vm1585_vm13 = vweird.f32 %v3029_v25 }
 0x185   : > { %2352 = vpow2.f32 %v2166_v54  ;;  %v1592_v58 = vor.u32 1.1754944e-38, %v1591_v62  ;;  %vm1590_vm0 = vcmp.eq.f32.partialorder %v1589_v16, 8.507059e+37 }
 0x186   : > { %v1294_v56 = vadd.f32 %v1253_v31, %v1150_v32  ;;  %v902_v13 = vmul.f32 %v3035_v48, %v901_v6  ;;  %v908_v32 = vand.u32 2147483647, %v3009_v0  ;;  %v992_v6 = vmul.f32 %v3050_v43, %v991_v26 }
 0x188   : > { %v1422_v45 = vadd.f32 %v2992_v36, %v1294_v56  ;;  %v903_v24 = vadd.f32 %v3035_v48, %v902_v13  ;;  %vm909_vm5 = vcmp.eq.f32.partialorder %v908_v32, 8.507059e+37 }
 0x189   : > { %v2351_v1 = vpop.eup %2350  ;;  %1440 = vrot.lane.b32.xlu1 %v3053_v51, %s3677_s26  ;;  %1312 = vrot.lane.b32.xlu2 %v3053_v51, %s3675_s13 }
 0x18a   : > { %1184 = vrot.lane.b32.xlu0 %v3053_v51, %s2512_s21  ;;  %v1581_v61 = vmul.f32 %v2351_v1, %v3029_v25  ;;  %vm1586_vm12 = vweird.f32 %v2351_v1  ;;  %v910_v25 = vand.u32 2147483648, %v3009_v0 }
 0x18b   : > { %v1447_v52 = vpop.permute.xlu1 %1446  ;;  %v3062_v5 = vpop.permute.xlu2 %1384  ;;  %vm1587_vm15 = vmor %vm1585_vm13, %vm1586_vm12 }
 0x18c   : > { %v1191_v36 = vpop.permute.xlu0 %1190  ;;  %v1582_v11 = vsub.f32 1.0, %v1581_v61  ;;  %v2353_v39 = vpop.eup %2352  ;;  %v911_v54 = vor.u32 1.1754944e-38, %v910_v25 }
 0x18d   : > { %v1231_v4 = vadd.f32 %v1191_v36, %v2853_v20  ;;  %v1000_v36 = vand.u32 2147483648, %v3023_v21  ;;  %v718_v25 = vpop.f32.mrf.mxu3 }
 0x18e   : > { %v1583_v15 = vmul.f32 %v2351_v1, %v1582_v11  ;;  %v998_v11 = vand.u32 2147483647, %v3023_v21 }
 0x18f   : > { %v1359_v23 = vadd.f32 %v3006_v46, %v1231_v4  ;;  %v737_v46 = vadd.f32 %v715_v22, %v597_v19  ;;  %v1001_v19 = vor.u32 1.1754944e-38, %v1000_v36 }
 0x190   : > { %v1584_v55 = vadd.f32 %v2351_v1, %v1583_v15  ;;  %vm999_vm8 = vcmp.eq.f32.partialorder %v998_v11, 8.507059e+37 }
 0x191   : > { %v3076_v20 = vadd.f32 %v1447_v52, %v1359_v23  ;;  %1376 = vrot.lane.b32.xlu2 %v3073_v49, %s3677_s26  ;;  %1104 = vrot.lane.b32.xlu1 %v3073_v49, %s2512_s21  ;;  %v757_v0 = vadd.f32 %v2810_v3, %v737_v46  ;;  %v3104_v52 = vmul.f32 %v2915_v17, %v2815_v10  ;;  %v600_v46 = vpop.f32.mrf.mxu1 }
 0x192   : > { %1248 = vrot.lane.b32.xlu0 %v3073_v49, %s3675_s13  ;;  %v1588_v29 = vsel %vm1587_vm15, %v2351_v1, %v1584_v55  ;;  %v907_v1 = vsel %vm906_vm3, %v3035_v48, %v903_v24  ;;  %v993_v10 = vadd.f32 %v3050_v43, %v992_v6 }
 0x193   : > { %2354 = vrcp.f32 %v3076_v20  ;;  %v1111_v27 = vpop.permute.xlu1 %1110  ;;  %v3089_v31 = vpop.permute.xlu2 %1322  ;;  %v1593_v35 = vsel %vm1590_vm0, %v1592_v58, %v1588_v29  ;;  %v3110_v48 = vsel %vm909_vm5, %v911_v54, %v907_v1  ;;  %v2167_v13 = vmul.f32 -1.442695, %v757_v0 }
 0x194   : > { %v1255_v2 = vpop.permute.xlu0 %1254  ;;  %v1151_v56 = vadd.f32 %v1111_v27, %v2866_v53  ;;  %v3096_v38 = vmul.f32 %v1593_v35, %v1422_v45  ;;  %v3107_v53 = vadd.f32 1.0, %v2353_v39  ;;  %v997_v21 = vsel %vm3123_vm7, %v3050_v43, %v993_v10 }
 0x195   : > { %v1605_v26 = vand.u32 2147483648, %v3076_v20  ;;  %v1603_v24 = vand.u32 2147483647, %v3076_v20  ;;  %v3138_v29 = vsel %vm999_vm8, %v1001_v19, %v997_v21  ;;  %vm1599_vm10 = vweird.f32 %v3076_v20  ;;  %v721_v21 = vpop.f32.mrf.mxu3 }
 0x196   : > { %v1295_v61 = vadd.f32 %v1255_v2, %v1151_v56  ;;  %2356 = vrcp.f32 %v3107_v53  ;;  %v738_v35 = vadd.f32 %v718_v25, %v600_v46  ;;  %vm1009_vm14 = vweird.f32 %v3107_v53 }
 0x197   : > { %2358 = vpow2.f32 %v2167_v13  ;;  %v1606_v43 = vor.u32 1.1754944e-38, %v1605_v26  ;;  %vm1604_vm12 = vcmp.eq.f32.partialorder %v1603_v24, 8.507059e+37 }
 0x198   : > { %v1423_v45 = vadd.f32 %v3019_v14, %v1295_v61  ;;  %v758_v36 = vadd.f32 %v2810_v3, %v738_v35 }
 0x199   : > { %v2355_v8 = vpop.eup %2354  ;;  %1114 = vrot.lane.b32.xlu1 %v3104_v52, %s2512_s21  ;;  %1314 = vrot.lane.b32.xlu2 %v3110_v48, %s3675_s13 }
 0x19a   : > { %1186 = vrot.lane.b32.xlu0 %v3110_v48, %s2512_s21  ;;  %v1595_v4 = vmul.f32 %v2355_v8, %v3076_v20  ;;  %vm1600_vm9 = vweird.f32 %v2355_v8 }
 0x19b   : > { %v1449_v62 = vpop.permute.xlu1 %1448  ;;  %v3128_v15 = vpop.permute.xlu2 %1324  ;;  %vm1601_vm11 = vmor %vm1599_vm10, %vm1600_vm9 }
 0x19c   : > { %v1193_v16 = vpop.permute.xlu0 %1192  ;;  %v1596_v22 = vsub.f32 1.0, %v1595_v4  ;;  %v3147_v32 = vpop.eup %2356  ;;  %v2168_v4 = vmul.f32 -1.442695, %v758_v36 }
 0x19d   : > { %v1232_v23 = vadd.f32 %v1193_v16, %v2886_v40  ;;  %v2359_v61 = vpop.eup %2358  ;;  %v1005_v54 = vmul.f32 %v3147_v32, %v3107_v53  ;;  %vm1010_vm15 = vweird.f32 %v3147_v32 }
 0x19e   : > { %v1597_v55 = vmul.f32 %v2355_v8, %v1596_v22  ;;  %v3164_v10 = vadd.f32 1.0, %v2359_v61  ;;  %vm3201_vm3 = vmor %vm1009_vm14, %vm1010_vm15 }
 0x19f   : > { %v1360_v58 = vadd.f32 %v3042_v30, %v1232_v23  ;;  %v603_v23 = vpop.f32.mrf.mxu1 }
 0x1a0   : > { %v1598_v27 = vadd.f32 %v2355_v8, %v1597_v55  ;;  %v739_v25 = vadd.f32 %v721_v21, %v603_v23  ;;  %v1737_v23 = vld [vmem:[%s3671_s5 + $0x8] sm:$0xff]  ;;  %vm1024_vm6 = vweird.f32 %v3164_v10 }
 0x1a1   : > { %v3141_v40 = vadd.f32 %v1449_v62, %v1360_v58  ;;  %1442 = vrot.lane.b32.xlu1 %v3110_v48, %s3677_s26  ;;  %1326 = vrot.lane.b32.xlu2 %v3138_v29, %s3675_s13  ;;  %v1013_v58 = vand.u32 2147483647, %v3107_v53  ;;  %v424_v21 = vld [vmem:[%s3672_s6 + $0x8] sm:$0xff] }
 0x1a2   : > { %1198 = vrot.lane.b32.xlu0 %v3138_v29, %s2512_s21  ;;  %v1602_v30 = vsel %vm1601_vm11, %v2355_v8, %v1598_v27  ;;  %v3162_v8 = vmul.f32 %v3110_v48, %v2795_v60  ;;  %v759_v36 = vadd.f32 %v2810_v3, %v739_v25 }
 0x1a3   : > { %2360 = vrcp.f32 %v3141_v40  ;;  %v1113_v20 = vpop.permute.xlu1 %1112  ;;  %v3152_v2 = vpop.permute.xlu2 %1368  ;;  %v1607_v56 = vsel %vm1604_vm12, %v1606_v43, %v1602_v30  ;;  %v1619_v22 = vand.u32 2147483648, %v3141_v40  ;;  %v1617_v55 = vand.u32 2147483647, %v3141_v40 }
 0x1a4   : > { %v1257_v39 = vpop.permute.xlu0 %1256  ;;  %v1152_v1 = vadd.f32 %v1113_v20, %v2897_v57  ;;  %v3155_v6 = vmul.f32 %v1607_v56, %v1423_v45  ;;  %v1006_v57 = vsub.f32 1.0, %v1005_v54  ;;  %2362 = vrcp.f32 %v3164_v10 }
 0x1a5   : > { %2364 = vpow2.f32 %v2168_v4  ;;  %vm1613_vm0 = vweird.f32 %v3141_v40  ;;  %v1620_v43 = vor.u32 1.1754944e-38, %v1619_v22  ;;  %vm1618_vm4 = vcmp.eq.f32.partialorder %v1617_v55, 8.507059e+37  ;;  %v1736_v55 = vld [vmem:[%s3671_s5] sm:$0xff] }
 0x1a6   : > { %v1296_v0 = vadd.f32 %v1257_v39, %v1152_v1  ;;  %v1007_v19 = vmul.f32 %v3147_v32, %v1006_v57  ;;  %vm1014_vm5 = vcmp.eq.f32.partialorder %v1013_v58, 8.507059e+37  ;;  %v3219_v4 = vmul.f32 %v2929_v33, %v2818_v18  ;;  %v1739_v18 = vld [vmem:[%s3671_s5 + $0x18] sm:$0xff]  ;;  %v423_v58 = vld [vmem:[%s3672_s6] sm:$0xff] }
 0x1a7   : > { %v2169_v3 = vmul.f32 -1.442695, %v759_v36  ;;  %1800 = vmatpush.msrb.mxu3 %v1739_v18  ;;  %v2399_v18 = vld [vmem:[%s2699_s25 + $0x8] sm:$0xff] }
 0x1a8   : > { %v1424_v11 = vadd.f32 %v3062_v5, %v1296_v0 }
 0x1a9   : > { %v2361_v14 = vpop.eup %2360  ;;  %1386 = vrot.lane.b32.xlu2 %v3104_v52, %s3677_s26  ;;  %1106 = vrot.lane.b32.xlu1 %v3162_v8, %s2512_s21 }
 0x1aa   : > { %1258 = vrot.lane.b32.xlu0 %v3104_v52, %s3675_s13  ;;  %v1609_v45 = vmul.f32 %v2361_v14, %v3141_v40  ;;  %vm1614_vm13 = vweird.f32 %v2361_v14  ;;  %v3195_v30 = vpop.eup %2362 }
 0x1ab   : > { %v1451_v60 = vpop.permute.xlu1 %1450  ;;  %v3174_v13 = vpop.permute.xlu2 %1306  ;;  %vm1615_vm2 = vmor %vm1613_vm0, %vm1614_vm13  ;;  %vm1025_vm7 = vweird.f32 %v3195_v30 }
 0x1ac   : > { %v1195_v5 = vpop.permute.xlu0 %1194  ;;  %v1610_v62 = vsub.f32 1.0, %v1609_v45  ;;  %v2365_v0 = vpop.eup %2364  ;;  %vm3274_vm8 = vmor %vm1024_vm6, %vm1025_vm7 }
 0x1ad   : > { %v1233_v16 = vadd.f32 %v1195_v5, %v2915_v17  ;;  %v1015_v17 = vand.u32 2147483648, %v3107_v53 }
 0x1ae   : > { %v1611_v26 = vmul.f32 %v2361_v14, %v1610_v62 }
 0x1af   : > { %v1361_v24 = vadd.f32 %v3089_v31, %v1233_v16  ;;  %v1008_v31 = vadd.f32 %v3147_v32, %v1007_v19  ;;  %v1016_v61 = vor.u32 1.1754944e-38, %v1015_v17  ;;  %v425_v19 = vld [vmem:[%s3672_s6 + $0x10] sm:$0xff] }
 0x1b0   : > { %v1612_v46 = vadd.f32 %v2361_v14, %v1611_v26 }
 0x1b1   : > { %v3187_v27 = vadd.f32 %v1451_v60, %v1361_v24  ;;  %1378 = vrot.lane.b32.xlu2 %v3162_v8, %s3677_s26  ;;  %1454 = vrot.lane.b32.xlu1 %v3138_v29, %s3677_s26  ;;  %v1012_v57 = vsel %vm3201_vm3, %v3147_v32, %v1008_v31  ;;  %v1030_v24 = vand.u32 2147483648, %v3164_v10 }
 0x1b2   : > { %1250 = vrot.lane.b32.xlu0 %v3162_v8, %s3675_s13  ;;  %v1616_v35 = vsel %vm1615_vm2, %v2361_v14, %v1612_v46  ;;  %v1020_v14 = vmul.f32 %v3195_v30, %v3164_v10  ;;  %v3223_v60 = vsel %vm1014_vm5, %v1016_v61, %v1012_v57  ;;  %v1028_v46 = vand.u32 2147483647, %v3164_v10  ;;  %v2398_v10 = vld [vmem:[%s2699_s25] sm:$0xff] }
 0x1b3   : > { %v1453_v20 = vpop.permute.xlu1 %1452  ;;  %v3205_v56 = vpop.permute.xlu2 %1434  ;;  %v1621_v39 = vsel %vm1618_vm4, %v1620_v43, %v1616_v35  ;;  %v3292_v57 = vmul.f32 %v3138_v29, %v2821_v28 }
 0x1b4   : > { %v1197_v1 = vpop.permute.xlu0 %1196  ;;  %v3207_v54 = vmul.f32 %v1621_v39, %v1424_v11  ;;  %v3221_v11 = vadd.f32 1.0, %v2365_v0  ;;  %v1021_v32 = vsub.f32 1.0, %v1020_v14  ;;  %vm1029_vm9 = vcmp.eq.f32.partialorder %v1028_v46, 8.507059e+37 }
 0x1b5   : > { %v1234_v53 = vadd.f32 %v1197_v1, %v2929_v33  ;;  %v426_v33 = vld [vmem:[%s3672_s6 + $0x18] sm:$0xff]  ;;  %v1031_v1 = vor.u32 1.1754944e-38, %v1030_v24 }
 0x1b6   : > { %1865 = vmatpush.msrb.mxu2 %v426_v33  ;;  %2366 = vrcp.f32 %v3221_v11  ;;  %v1022_v26 = vmul.f32 %v3195_v30, %v1021_v32  ;;  %vm1039_vm10 = vweird.f32 %v3221_v11 }
 0x1b7   : > { %v1362_v45 = vadd.f32 %v3128_v15, %v1234_v53  ;;  %v1738_v15 = vld [vmem:[%s3671_s5 + $0x10] sm:$0xff]  ;;  %2368 = vpow2.f32 %v2169_v3 }
 0x1b8   : > { %1801 = vmatpush.msrb.mxu3 %v1738_v15  ;;  %1866 = vmatpush.msrb.mxu2 %v425_v19  ;;  %v1023_v17 = vadd.f32 %v3195_v30, %v1022_v26  ;;  %v1045_v19 = vand.u32 2147483648, %v3221_v11 }
 0x1b9   : > { %v3225_v5 = vadd.f32 %v1453_v20, %v1362_v45  ;;  %1328 = vrot.lane.b32.xlu2 %v3223_v60, %s3675_s13  ;;  %1116 = vrot.lane.b32.xlu1 %v3219_v4, %s2512_s21  ;;  %s2204_s13 = sshll.u32 %s2492_s30, 5 }
 0x1ba   : > { %1200 = vrot.lane.b32.xlu0 %v3223_v60, %s2512_s21  ;;  %1802 = vmatpush.msrb.mxu3 %v1737_v23  ;;  %v1027_v0 = vsel %vm3274_vm8, %v3195_v30, %v1023_v17  ;;  %v1046_v46 = vor.u32 1.1754944e-38, %v1045_v19  ;;  %s1982_s14 = sadd.s32 %s2204_s13, %s2633_s24 }
 0x1bb   : > { %v1433_v62 = vpop.permute.xlu1 %1432  ;;  %v3242_v16 = vpop.permute.xlu2 %1370  ;;  %1867 = vmatpush.msrb.mxu2 %v424_v21  ;;  %v3294_v14 = vsel %vm1029_vm9, %v1031_v1, %v1027_v0  ;;  %s2205_s22 = sshll.u32 %s1982_s14, 3 }
 0x1bc   : > { %v1177_v22 = vpop.permute.xlu0 %1176  ;;  %v3270_v25 = vpop.eup %2366  ;;  %1803 = vmatpush.msrb.mxu3 %v1736_v55 }
 0x1bd   : > { %v2369_v43 = vpop.eup %2368  ;;  %v1224_v40 = vadd.f32 %v1177_v22, %v2938_v37  ;;  %1868 = vmatpush.msrb.mxu2 %v423_v58  ;;  %v1035_v36 = vmul.f32 %v3270_v25, %v3221_v11  ;;  %vm1040_vm11 = vweird.f32 %v3270_v25 }
 0x1be   : > { %2186 = vmatmul.msk.f32.vlgmr.msrb.gmra.mxu2 %vm610_vm1, %v2398_v10  ;;  %v3288_v37 = vadd.f32 1.0, %v2369_v43  ;;  %vm3328_vm12 = vmor %vm1039_vm10, %vm1040_vm11 }
 0x1bf   : > { %v1036_v30 = vsub.f32 1.0, %v1035_v36 }
 0x1c0   : > { %vm1054_vm4 = vweird.f32 %v3288_v37 }
 0x1c1   : > { %1388 = vrot.lane.b32.xlu2 %v3219_v4, %s3687_s17  ;;  %1456 = vrot.lane.b32.xlu1 %v3223_v60, %s3687_s17  ;;  %v1037_v33 = vmul.f32 %v3270_v25, %v1036_v30 }
 0x1c2   : > { %1260 = vrot.lane.b32.xlu0 %v3219_v4, %s3688_s20 }
 0x1c3   : > { %v1097_v35 = vpop.permute.xlu1 %1096  ;;  %v3279_v20 = vpop.permute.xlu2 %1308 }
 0x1c4   : > { %v1305_v39 = vpop.permute.xlu0 %1304  ;;  %v1144_v55 = vadd.f32 %v1097_v35, %v2943_v42  ;;  %v2400_v35 = vld [vmem:[%s2699_s25 + $0x10] sm:$0xff] }
 0x1c5   : > { %v1352_v61 = vadd.f32 %v1305_v39, %v1224_v40 }
 0x1c6   : > { %2187 = vmatmul.msk.f32.gmra.mxu2 %vm610_vm1, %v2399_v18 }
 0x1c7   : > { %v1480_v53 = vadd.f32 %v1433_v62, %v1352_v61  ;;  %v3343_v61 = vmul.f32 %v3223_v60, %v2826_v44 }
 0x1c9   : > { %2370 = vrcp.f32 %v1480_v53  ;;  %1330 = vrot.lane.b32.xlu2 %v3294_v14, %s3688_s20  ;;  %1118 = vrot.lane.b32.xlu1 %v3292_v57, %s2512_s21  ;;  %v1507_v24 = vand.u32 2147483648, %v1480_v53  ;;  %v1505_v42 = vand.u32 2147483647, %v1480_v53  ;;  %vm1501_vm15 = vweird.f32 %v1480_v53 }
 0x1ca   : > { %2372 = vrcp.f32 %v3288_v37  ;;  %1202 = vrot.lane.b32.xlu0 %v3294_v14, %s2512_s21 }
 0x1cb   : > { %v1179_v45 = vpop.permute.xlu1 %1178  ;;  %v3303_v3 = vpop.permute.xlu2 %1372  ;;  %v1508_v10 = vor.u32 1.1754944e-38, %v1507_v24  ;;  %vm1506_vm2 = vcmp.eq.f32.partialorder %v1505_v42, 8.507059e+37 }
 0x1cc   : > { %v1241_v28 = vpop.permute.xlu0 %1240  ;;  %v1225_v32 = vadd.f32 %v1179_v45, %v2954_v9  ;;  %v1038_v9 = vadd.f32 %v3270_v25, %v1037_v33 }
 0x1cd   : > { %v1288_v43 = vadd.f32 %v1241_v28, %v1144_v55 }
 0x1ce   : > { %v1353_v15 = vadd.f32 %v3174_v13, %v1225_v32  ;;  %v1043_v13 = vand.u32 2147483647, %v3221_v11  ;;  %2188 = vmatmul.msk.f32.gmra.mxu2 %vm610_vm1, %v2400_v35  ;;  %v1042_v39 = vsel %vm3328_vm12, %v3270_v25, %v1038_v9 }
 0x1cf   : > { %v2371_v62 = vpop.eup %2370  ;;  %v1416_v45 = vadd.f32 %v3152_v2, %v1288_v43 }
 0x1d0   : > { %v3313_v22 = vpop.eup %2372  ;;  %v1497_v23 = vmul.f32 %v2371_v62, %v1480_v53  ;;  %v3316_v21 = vadd.f32 %v3205_v56, %v1353_v15  ;;  %vm1502_vm13 = vweird.f32 %v2371_v62  ;;  %vm1044_vm14 = vcmp.eq.f32.partialorder %v1043_v13, 8.507059e+37 }
 0x1d1   : > { %1390 = vrot.lane.b32.xlu2 %v3292_v57, %s3687_s17  ;;  %1458 = vrot.lane.b32.xlu1 %v3294_v14, %s3687_s17  ;;  %v1050_v11 = vmul.f32 %v3313_v22, %v3288_v37  ;;  %vm1503_vm0 = vmor %vm1501_vm15, %vm1502_vm13  ;;  %v3346_v28 = vsel %vm1044_vm14, %v1046_v46, %v1042_v39  ;;  %vm1055_vm6 = vweird.f32 %v3313_v22  ;;  %v1058_v46 = vand.u32 2147483647, %v3288_v37  ;;  %v2402_v39 = vld [vmem:[%s2699_s25 + $0x20] sm:$0xff] }
 0x1d2   : > { %v1498_v26 = vsub.f32 1.0, %v1497_v23  ;;  %2374 = vrcp.f32 %v3316_v21  ;;  %1262 = vrot.lane.b32.xlu0 %v3292_v57, %s3688_s20  ;;  %v2401_v23 = vld [vmem:[%s2699_s25 + $0x18] sm:$0xff]  ;;  %vm1515_vm5 = vweird.f32 %v3316_v21  ;;  %vm1056_vm9 = vmor %vm1054_vm4, %vm1055_vm6 }
 0x1d3   : > { %v1099_v58 = vpop.permute.xlu1 %1098  ;;  %v3332_v17 = vpop.permute.xlu2 %1310  ;;  %v1051_v0 = vsub.f32 1.0, %v1050_v11  ;;  %v1060_v11 = vand.u32 2147483648, %v3288_v37  ;;  %vm1059_vm10 = vcmp.eq.f32.partialorder %v1058_v46, 8.507059e+37  ;;  %v3389_v37 = vmul.f32 %v3294_v14, %v2842_v7 }
 0x1d4   : > { %v1499_v31 = vmul.f32 %v2371_v62, %v1498_v26  ;;  %v1243_v40 = vpop.permute.xlu0 %1242  ;;  %v1145_v25 = vadd.f32 %v1099_v58, %v2972_v63  ;;  %v1519_v63 = vand.u32 2147483647, %v3316_v21 }
 0x1d5   : > { %v1052_v19 = vmul.f32 %v3313_v22, %v1051_v0  ;;  %v1061_v35 = vor.u32 1.1754944e-38, %v1060_v11 }
 0x1d6   : > { %v1500_v1 = vadd.f32 %v2371_v62, %v1499_v31  ;;  %2189 = vmatmul.msk.f32.gmra.mxu2 %vm610_vm1, %v2401_v23  ;;  %v1289_v9 = vadd.f32 %v1243_v40, %v1145_v25  ;;  %vm1520_vm8 = vcmp.eq.f32.partialorder %v1519_v63, 8.507059e+37  ;;  %v2403_v25 = vld [vmem:[%s2699_s25 + $0x28] sm:$0xff] }
 0x1d7   : > { %v1053_v58 = vadd.f32 %v3313_v22, %v1052_v19 }
 0x1d8   : > { %v2375_v36 = vpop.eup %2374  ;;  %v1504_v30 = vsel %vm1503_vm0, %v2371_v62, %v1500_v1  ;;  %v1521_v62 = vand.u32 2147483648, %v3316_v21 }
 0x1d9   : > { %v1509_v32 = vsel %vm1506_vm2, %v1508_v10, %v1504_v30  ;;  %1332 = vrot.lane.b32.xlu2 %v3346_v28, %s3688_s20  ;;  %1120 = vrot.lane.b32.xlu1 %v3343_v61, %s2512_s21  ;;  %v1511_v44 = vmul.f32 %v2375_v36, %v3316_v21  ;;  %vm1516_vm3 = vweird.f32 %v2375_v36  ;;  %v1057_v1 = vsel %vm1056_vm9, %v3313_v22, %v1053_v58 }
 0x1da   : > { %v1720_v53 = vmul.f32 %v1509_v32, %v1416_v45  ;;  %1204 = vrot.lane.b32.xlu0 %v3346_v28, %s2512_s21  ;;  %vm1517_vm7 = vmor %vm1515_vm5, %vm1516_vm3  ;;  %v1522_v24 = vor.u32 1.1754944e-38, %v1521_v62  ;;  %v3391_v10 = vsel %vm1059_vm10, %v1061_v35, %v1057_v1 }
 0x1db   : > { %v1437_v18 = vpop.permute.xlu1 %1436  ;;  %v3356_v2 = vpop.permute.xlu2 %1374  ;;  %v1512_v33 = vsub.f32 1.0, %v1511_v44 }
 0x1dc   : > { %2170 = vmatmul.msk.f32.vlgmr.msrb.gmra.mxu3 %vm610_vm1, %v1720_v53  ;;  %v1181_v15 = vpop.permute.xlu0 %1180 }
 0x1dd   : > { %v1226_v13 = vadd.f32 %v1181_v15, %v2984_v34  ;;  %v1513_v26 = vmul.f32 %v2375_v36, %v1512_v33  ;;  %v1417_v34 = vadd.f32 %v3242_v16, %v1289_v9 }
 0x1de   : > { %2190 = vmatmul.msk.f32.gmra.mxu2 %vm610_vm1, %v2402_v39 }
 0x1df   : > { %v1354_v55 = vadd.f32 %v3279_v20, %v1226_v13  ;;  %v1514_v56 = vadd.f32 %v2375_v36, %v1513_v26 }
 0x1e1   : > { %v1482_v31 = vadd.f32 %v1437_v18, %v1354_v55  ;;  %1392 = vrot.lane.b32.xlu2 %v3343_v61, %s3687_s17  ;;  %1460 = vrot.lane.b32.xlu1 %v3346_v28, %s3687_s17  ;;  %v1518_v20 = vsel %vm1517_vm7, %v2375_v36, %v1514_v56  ;;  %v2404_v55 = vld [vmem:[%s2699_s25 + $0x30] sm:$0xff] }
 0x1e2   : > { %1264 = vrot.lane.b32.xlu0 %v3343_v61, %s3688_s20  ;;  %v1523_v21 = vsel %vm1520_vm8, %v1522_v24, %v1518_v20  ;;  %v2405_v20 = vld [vmem:[%s2699_s25 + $0x38] sm:$0xff] }
 0x1e3   : > { %2376 = vrcp.f32 %v1482_v31  ;;  %v1101_v42 = vpop.permute.xlu1 %1100  ;;  %v3381_v43 = vpop.permute.xlu2 %1312  ;;  %v1721_v16 = vmul.f32 %v1523_v21, %v1417_v34  ;;  %v1535_v53 = vand.u32 2147483648, %v1482_v31  ;;  %v1533_v15 = vand.u32 2147483647, %v1482_v31 }
 0x1e4   : > { %v1245_v40 = vpop.permute.xlu0 %1244  ;;  %v1146_v36 = vadd.f32 %v1101_v42, %v2998_v41  ;;  %vm1529_vm12 = vweird.f32 %v1482_v31 }
 0x1e5   : > { %2171 = vmatmul.msk.f32.gmra.mxu3 %vm610_vm1, %v1721_v16  ;;  %v1536_v19 = vor.u32 1.1754944e-38, %v1535_v53  ;;  %vm1534_vm14 = vcmp.eq.f32.partialorder %v1533_v15, 8.507059e+37 }
 0x1e6   : > { %2191 = vmatmul.msk.f32.gmra.mxu2 %vm610_vm1, %v2403_v25  ;;  %v1290_v18 = vadd.f32 %v1245_v40, %v1146_v36 }
 0x1e9   : > { %v2377_v0 = vpop.eup %2376  ;;  %1334 = vrot.lane.b32.xlu2 %v3391_v10, %s3688_s20  ;;  %1122 = vrot.lane.b32.xlu1 %v3389_v37, %s2512_s21 }
 0x1ea   : > { %1206 = vrot.lane.b32.xlu0 %v3391_v10, %s2512_s21  ;;  %v1525_v22 = vmul.f32 %v2377_v0, %v1482_v31  ;;  %vm1530_vm11 = vweird.f32 %v2377_v0 }
 0x1eb   : > { %v1439_v30 = vpop.permute.xlu1 %1438  ;;  %v3400_v32 = vpop.permute.xlu2 %1376  ;;  %vm1531_vm13 = vmor %vm1529_vm12, %vm1530_vm11 }
 0x1ec   : > { %v1183_v45 = vpop.permute.xlu0 %1182  ;;  %v1526_v7 = vsub.f32 1.0, %v1525_v22 }
 0x1ed   : > { %v1227_v44 = vadd.f32 %v1183_v45, %v3011_v12  ;;  %v1418_v12 = vadd.f32 %v3303_v3, %v1290_v18  ;;  %v3418_v3 = vmul.f32 %v3346_v28, %v2765_v47 }
 0x1ee   : > { %v1527_v33 = vmul.f32 %v2377_v0, %v1526_v7  ;;  %2192 = vmatmul.msk.f32.gmra.mxu2 %vm610_vm1, %v2404_v55  ;;  %v2406_v7 = vld [vmem:[%s2699_s25 + $0x40] sm:$0xff] }
 0x1ef   : > { %v1355_v41 = vadd.f32 %v3332_v17, %v1227_v44 }
 0x1f0   : > { %v1528_v63 = vadd.f32 %v2377_v0, %v1527_v33 }
 0x1f1   : > { %v1483_v62 = vadd.f32 %v1439_v30, %v1355_v41  ;;  %1394 = vrot.lane.b32.xlu2 %v3389_v37, %s3687_s17  ;;  %1462 = vrot.lane.b32.xlu1 %v3391_v10, %s3687_s17  ;;  %v2407_v41 = vld [vmem:[%s2699_s25 + $0x48] sm:$0xff] }
 0x1f2   : > { %1266 = vrot.lane.b32.xlu0 %v3389_v37, %s3688_s20  ;;  %v1532_v23 = vsel %vm1531_vm13, %v2377_v0, %v1528_v63  ;;  %vm1627_vm13 = vweird.f32 %v3187_v27 }
 0x1f3   : > { %2378 = vrcp.f32 %v1483_v62  ;;  %v1103_v17 = vpop.permute.xlu1 %1102  ;;  %v1537_v9 = vsel %vm1534_vm14, %v1536_v19, %v1532_v23  ;;  %v1315_v56 = vpop.permute.xlu2 %1314  ;;  %v1549_v21 = vand.u32 2147483648, %v1483_v62  ;;  %v1547_v40 = vand.u32 2147483647, %v1483_v62 }
 0x1f4   : > { %v1247_v13 = vpop.permute.xlu0 %1246  ;;  %v1722_v26 = vmul.f32 %v1537_v9, %v1418_v12  ;;  %v1147_v58 = vadd.f32 %v1103_v17, %v3027_v59  ;;  %v3433_v59 = vmul.f32 %v3391_v10, %v2773_v50  ;;  %vm1543_vm0 = vweird.f32 %v1483_v62 }
 0x1f5   : > { %vm1548_vm3 = vcmp.eq.f32.partialorder %v1547_v40, 8.507059e+37 }
 0x1f6   : > { %2172 = vmatmul.msk.f32.gmra.mxu3 %vm610_vm1, %v1722_v26  ;;  %2193 = vmatmul.msk.f32.gmra.mxu2 %vm610_vm1, %v2405_v20  ;;  %v1291_v42 = vadd.f32 %v1247_v13, %v1147_v58 }
 0x1f9   : > { %v2379_v24 = vpop.eup %2378  ;;  %1396 = vrot.lane.b32.xlu2 %v3418_v3, %s3687_s17  ;;  %1268 = vrot.lane.b32.xlu1 %v3418_v3, %s3688_s20 }
 0x1fa   : > { %1124 = vrot.lane.b32.xlu0 %v3418_v3, %s2512_s21  ;;  %v1539_v46 = vmul.f32 %v2379_v24, %v1483_v62  ;;  %vm1544_vm15 = vweird.f32 %v2379_v24 }
 0x1fb   : > { %v1441_v11 = vpop.permute.xlu1 %1440  ;;  %v3435_v39 = vpop.permute.xlu2 %1326  ;;  %vm1545_vm2 = vmor %vm1543_vm0, %vm1544_vm15 }
 0x1fc   : > { %v1185_v34 = vpop.permute.xlu0 %1184  ;;  %v1540_v31 = vsub.f32 1.0, %v1539_v46 }
 0x1fd   : > { %v1228_v47 = vadd.f32 %v1185_v34, %v3053_v51  ;;  %v1550_v51 = vor.u32 1.1754944e-38, %v1549_v21 }
 0x1fe   : > { %v1541_v16 = vmul.f32 %v2379_v24, %v1540_v31  ;;  %2194 = vmatmul.msk.f32.gmra.mxu2 %vm610_vm1, %v2406_v7 }
 0x1ff   : > { %v1356_v35 = vadd.f32 %v3381_v43, %v1228_v47  ;;  %v1419_v43 = vadd.f32 %v3356_v2, %v1291_v42 }
 0x200   : > { %v1542_v1 = vadd.f32 %v2379_v24, %v1541_v16 }
 0x201   : > { %v1484_v0 = vadd.f32 %v1441_v11, %v1356_v35  ;;  %1398 = vrot.lane.b32.xlu2 %v3433_v59, %s3687_s17  ;;  %1270 = vrot.lane.b32.xlu1 %v3433_v59, %s3688_s20  ;;  %s2434_s17 = scalar_lea.hbm %s3674_s8, 512 }
 0x202   : > { %1126 = vrot.lane.b32.xlu0 %v3433_v59, %s2512_s21  ;;  %v1546_v50 = vsel %vm1545_vm2, %v2379_v24, %v1542_v1  ;;  %vm1641_vm2 = vweird.f32 %v3225_v5  ;;  %s1984_s21 = scalar_lea.hbm %s3674_s8, %s2205_s22 }
 0x203   : > { %2380 = vrcp.f32 %v1484_v0  ;;  %v1105_v36 = vpop.permute.xlu1 %1104  ;;  %v1551_v22 = vsel %vm1548_vm3, %v1550_v51, %v1546_v50  ;;  %v3448_v2 = vpop.permute.xlu2 %1386  ;;  %v1561_v63 = vand.u32 2147483647, %v1484_v0  ;;  %v1563_v62 = vand.u32 2147483648, %v1484_v0  ;;  %s1987_s1 = sshll.u32 %s1984_s21, 4  ;;  %s1988_s1 = int_to_ptr.hbm [resolvable:$true] %s1987_s1 }
 0x204   : > { %v1249_v30 = vpop.permute.xlu0 %1248  ;;  %v1723_v45 = vmul.f32 %v1551_v22, %v1419_v43  ;;  %v1148_v44 = vadd.f32 %v1105_v36, %v3073_v49  ;;  %vm1557_vm5 = vweird.f32 %v1484_v0  ;;  %v2410_v36 = vld [vmem:[%s2699_s25 + $0x60] sm:$0xff] }
 0x205   : > { %v1564_v49 = vor.u32 1.1754944e-38, %v1563_v62  ;;  %vm1562_vm7 = vcmp.eq.f32.partialorder %v1561_v63, 8.507059e+37 }
 0x206   : > { %2173 = vmatmul.msk.f32.gmra.mxu3 %vm610_vm1, %v1723_v45  ;;  %2195 = vmatmul.msk.f32.gmra.mxu2 %vm610_vm1, %v2407_v41  ;;  %v1292_v19 = vadd.f32 %v1249_v30, %v1148_v44 }
 0x208   : > { %v1420_v9 = vadd.f32 %v3400_v32, %v1292_v19  ;;  %v2409_v32 = vld [vmem:[%s2699_s25 + $0x58] sm:$0xff] }
 0x209   : > { %v2381_v25 = vpop.eup %2380 }
 0x20a   : > { %v1553_v53 = vmul.f32 %v2381_v25, %v1484_v0  ;;  %vm1558_vm4 = vweird.f32 %v2381_v25 }
 0x20b   : > { %v3450_v18 = vpop.permute.xlu1 %1114  ;;  %vm1559_vm6 = vmor %vm1557_vm5, %vm1558_vm4  ;;  %v1379_v58 = vpop.permute.xlu2 %1378 }
 0x20c   : > { %v1187_v33 = vpop.permute.xlu0 %1186  ;;  %v1554_v15 = vsub.f32 1.0, %v1553_v53 }
 0x20d   : > { %v1229_v12 = vadd.f32 %v1187_v33, %v3110_v48  ;;  %v2408_v48 = vld [vmem:[%s2699_s25 + $0x50] sm:$0xff]  ;;  %v2411_v33 = vld [vmem:[%s2699_s25 + $0x68] sm:$0xff] }
 0x20e   : > { %v1555_v23 = vmul.f32 %v2381_v25, %v1554_v15  ;;  %2196 = vmatmul.msk.f32.gmra.mxu2 %vm610_vm1, %v2408_v48 }
 0x20f   : > { %v1357_v13 = vadd.f32 %v1315_v56, %v1229_v12  ;;  %v2412_v12 = vld [vmem:[%s2699_s25 + $0x70] sm:$0xff] }
 0x210   : > { %v1556_v17 = vadd.f32 %v2381_v25, %v1555_v23 }
 0x212   : > { %v1560_v26 = vsel %vm1559_vm6, %v2381_v25, %v1556_v17 }
 0x213   : > { %v1443_v55 = vpop.permute.xlu1 %1442  ;;  %v1565_v24 = vsel %vm1562_vm7, %v1564_v49, %v1560_v26  ;;  %v1329_v21 = vpop.permute.xlu2 %1328 }
 0x214   : > { %v1485_v46 = vadd.f32 %v1443_v55, %v1357_v13  ;;  %v1199_v11 = vpop.permute.xlu0 %1198  ;;  %v1724_v34 = vmul.f32 %v1565_v24, %v1420_v9  ;;  %v2413_v24 = vld [vmem:[%s2699_s25 + $0x78] sm:$0xff]  ;;  %s352_s25 = sand.u32 1, %s2484_s28  }
 0x215   : > { %v1235_v41 = vadd.f32 %v1199_v11, %v3138_v29  ;;  %s2099_s9 = sshll.u32 %s352_s25, 7  ;;  %s1971_s24 = scalar_lea.sflag [#allocation3], %s352_s25 }
 0x216   : > { %2382 = vrcp.f32 %v1485_v46  ;;  %2174 = vmatmul.msk.f32.gmra.mxu3 %vm610_vm1, %v1724_v34  ;;  %2197 = vmatmul.msk.f32.gmra.mxu2 %vm610_vm1, %v2409_v32  ;;  %v1577_v16 = vand.u32 2147483648, %v1485_v46  ;;  %v1575_v35 = vand.u32 2147483647, %v1485_v46  ;;  %vm1571_vm9 = vweird.f32 %v1485_v46  ;;  %s3575_s26 = scalar_lea.vmem [#allocation2], %s2099_s9  ;;  %s2428_s9 = sshra.s32 %s1988_s1, 4  ;;  %s2429_s9 = int_to_ptr.hbm [resolvable:$true] %s2428_s9 }
 0x217   : > { %2384 = vrcp.f32 %v3187_v27  ;;  %v1363_v17 = vadd.f32 %v3435_v39, %v1235_v41  ;;  %v1633_v32 = vand.u32 2147483648, %v3187_v27  ;;  %s1985_s30 = sshll.u32 %s3575_s26, 4  ;;  %s2430_s13 = scalar_lea.hbm %s2429_s9, 128  ;;  %s1986_s30 = int_to_ptr.vmem [resolvable:$true] %s1985_s30 }
 0x218   : > { %v1578_v50 = vor.u32 1.1754944e-38, %v1577_v16  ;;  %vm1576_vm11 = vcmp.eq.f32.partialorder %v1575_v35, 8.507059e+37  ;;  %2386 = vrcp.f32 %v3225_v5  ;;  %p2431_p0 = scmp.ne.s32.totalorder %s2429_s9, %s2430_s13  ;;  %p2435_p4 = scmp.lt.s32.totalorder %s2429_s9, %s3674_s8 }
 0x219   : > { %p2436_p5 = scmp.lt.s32.totalorder %s2434_s17, %s2430_s13 }
 0x21a   : > { %p2432_p1 = pnand %p2431_p0, %p2611_p3 }
 0x21b   : > { %v1107_v31 = vpop.permute.xlu1 %1106  ;;  %v3464_v25 = vpop.permute.xlu2 %1388  ;;  %p2437_p6 = por %p2436_p5, %p2435_p4 }
 0x21c   : > { %v2383_v20 = vpop.eup %2382  ;;  %v1259_v47 = vpop.permute.xlu0 %1258  ;;  %v1149_v1 = vadd.f32 %v1107_v31, %v3162_v8  ;;  %p2433_p2 = pneg %p2432_p1 }
 0x21d   : > { %v1567_v56 = vmul.f32 %v2383_v20, %v1485_v46  ;;  %vm1572_vm8 = vweird.f32 %v2383_v20  ;;  %v2385_v15 = vpop.eup %2384 }
 0x21e   : > { %vm1573_vm10 = vmor %vm1571_vm9, %vm1572_vm8  ;;  %2198 = vmatmul.msk.f32.gmra.mxu2 %vm610_vm1, %v2410_v36  ;;  %v1623_v23 = vmul.f32 %v2385_v15, %v3187_v27  ;;  %v3480_v29 = vpop.eup %2386  ;;  %vm1628_vm12 = vweird.f32 %v2385_v15  ;;  %v1647_v36 = vand.u32 2147483648, %v3225_v5  ;;  %p2438_p7 = pnand %p2437_p6, %p2433_p2 }
 0x21f   : > { %v1568_v42 = vsub.f32 1.0, %v1567_v56  ;;  %vm1629_vm14 = vmor %vm1627_vm13, %vm1628_vm12  ;;  %vm1642_vm0 = vweird.f32 %v3480_v29 }
 0x220   : > { %v1624_v9 = vsub.f32 1.0, %v1623_v23  ;;  %vm1643_vm3 = vmor %vm1641_vm2, %vm1642_vm0 }
 0x221   : > { %v1569_v40 = vmul.f32 %v2383_v20, %v1568_v42 }
 0x222   : > { %v1625_v39 = vmul.f32 %v2385_v15, %v1624_v9 }
 0x223   : > { %v1455_v0 = vpop.permute.xlu1 %1454  ;;  %v1570_v51 = vadd.f32 %v2383_v20, %v1569_v40  ;;  %v1331_v63 = vpop.permute.xlu2 %1330 }
 0x224   : > { %v1251_v43 = vpop.permute.xlu0 %1250  ;;  %v3478_v49 = vadd.f32 %v1455_v0, %v1363_v17  ;;  %v1626_v34 = vadd.f32 %v2385_v15, %v1625_v39 }
 0x225   : > { %v1293_v22 = vadd.f32 %v1251_v43, %v1149_v1  ;;  %v1574_v30 = vsel %vm1573_vm10, %v2383_v20, %v1570_v51 }
 0x226   : > { %v1579_v45 = vsel %vm1576_vm11, %v1578_v50, %v1574_v30  ;;  %2199 = vmatmul.msk.f32.gmra.mxu2 %vm610_vm1, %v2411_v33  ;;  %2388 = vrcp.f32 %v3478_v49  ;;  %v1648_v33 = vor.u32 1.1754944e-38, %v1647_v36  ;;  %v1661_v17 = vand.u32 2147483648, %v3478_v49 }
 0x227   : > { %v1421_v7 = vadd.f32 %v1379_v58, %v1293_v22  ;;  %v1637_v58 = vmul.f32 %v3480_v29, %v3225_v5  ;;  %vm1655_vm6 = vweird.f32 %v3478_v49 }
 0x228   : > { %v1662_v39 = vor.u32 1.1754944e-38, %v1661_v17 }
 0x229   : > { %v1725_v44 = vmul.f32 %v1579_v45, %v1421_v7  ;;  %v1638_v48 = vsub.f32 1.0, %v1637_v58 }
 0x22b   : > { %2175 = vmatmul.msk.f32.gmra.mxu3 %vm610_vm1, %v1725_v44  ;;  %v1117_v8 = vpop.permute.xlu1 %1116  ;;  %v3486_v26 = vpop.permute.xlu2 %1390  ;;  %v1639_v42 = vmul.f32 %v3480_v29, %v1638_v48 }
 0x22c   : > { %v1201_v53 = vpop.permute.xlu0 %1200  ;;  %v3496_v31 = vpop.eup %2388  ;;  %v1154_v35 = vadd.f32 %v1117_v8, %v3219_v4  ;;  %v1645_v4 = vand.u32 2147483647, %v3225_v5 }
 0x22d   : > { %v1236_v13 = vadd.f32 %v1201_v53, %v3223_v60  ;;  %v1153_v60 = vadd.f32 %v3450_v18, %v3104_v52  ;;  %v1631_v52 = vand.u32 2147483647, %v3187_v27  ;;  %v1640_v43 = vadd.f32 %v3480_v29, %v1639_v42 }
 0x22e   : > { %2200 = vmatmul.msk.f32.gmra.mxu2 %vm610_vm1, %v2412_v12  ;;  %vm1646_vm4 = vcmp.eq.f32.partialorder %v1645_v4, 8.507059e+37  ;;  %vm1656_vm5 = vweird.f32 %v3496_v31 }
 0x22f   : > { %v1364_v46 = vadd.f32 %v1329_v21, %v1236_v13  ;;  %v1651_v21 = vmul.f32 %v3496_v31, %v3478_v49  ;;  %vm1632_vm15 = vcmp.eq.f32.partialorder %v1631_v52, 8.507059e+37  ;;  %v1644_v44 = vsel %vm1643_vm3, %v3480_v29, %v1640_v43  ;;  %vm1657_vm7 = vmor %vm1655_vm6, %vm1656_vm5 }
 0x230   : > { %v1649_v41 = vsel %vm1646_vm4, %v1648_v33, %v1644_v44 }
 0x231   : > { %v1652_v0 = vsub.f32 1.0, %v1651_v21 }
 0x233   : > { %2176 = vmatmul.msk.f32.gmra.mxu3 %vm610_vm1, %v3096_v38  ;;  %v1457_v62 = vpop.permute.xlu1 %1456  ;;  %v1333_v16 = vpop.permute.xlu2 %1332  ;;  %v1653_v8 = vmul.f32 %v3496_v31, %v1652_v0 }
 0x234   : > { %v1261_v19 = vpop.permute.xlu0 %1260  ;;  %v3494_v11 = vadd.f32 %v1457_v62, %v1364_v46 }
 0x235   : > { %v1298_v51 = vadd.f32 %v1261_v19, %v1154_v35  ;;  %v1654_v19 = vadd.f32 %v3496_v31, %v1653_v8 }
 0x236   : > { %2201 = vmatmul.msk.f32.gmra.mxu2 %vm610_vm1, %v2413_v24  ;;  %2390 = vrcp.f32 %v3494_v11  ;;  %v1675_v48 = vand.u32 2147483648, %v3494_v11  ;;  %vm1669_vm10 = vweird.f32 %v3494_v11 }
 0x237   : > { %v1426_v45 = vadd.f32 %v3464_v25, %v1298_v51 }
 0x238   : > { %v1676_v42 = vor.u32 1.1754944e-38, %v1675_v48 }
 0x239   : > { %v1730_v25 = vmul.f32 %v1649_v41, %v1426_v45 }
 0x23b   : > { %2177 = vmatmul.msk.f32.gmra.mxu3 %vm610_vm1, %v3155_v6  ;;  %v1119_v38 = vpop.permute.xlu1 %1118  ;;  %v1297_v6 = vadd.f32 %v1259_v47, %v1153_v60  ;;  %v1393_v5 = vpop.permute.xlu2 %1392 }
 0x23c   : > { %v1203_v55 = vpop.permute.xlu0 %1202  ;;  %v3514_v50 = vpop.eup %2390 }
 0x23d   : > { %v1237_v20 = vadd.f32 %v1203_v55, %v3294_v14  ;;  %v1425_v47 = vadd.f32 %v3448_v2, %v1297_v6  ;;  %v1630_v14 = vsel %vm1629_vm14, %v2385_v15, %v1626_v34  ;;  %v1665_v7 = vmul.f32 %v3514_v50, %v3494_v11 }
 0x23e   : > { %v1155_v15 = vadd.f32 %v1119_v38, %v3292_v57  ;;  %v1659_v57 = vand.u32 2147483647, %v3478_v49  ;;  %v1658_v55 = vsel %vm1657_vm7, %v3496_v31, %v1654_v19  ;;  %vm1670_vm9 = vweird.f32 %v3514_v50 }
 0x23f   : > { %v1365_v40 = vadd.f32 %v1331_v63, %v1237_v20  ;;  %v1666_v63 = vsub.f32 1.0, %v1665_v7  ;;  %vm1671_vm11 = vmor %vm1669_vm10, %vm1670_vm9 }
 0x240   : > { %vm1660_vm8 = vcmp.eq.f32.partialorder %v1659_v57, 8.507059e+37 }
 0x241   : > { %v1667_v24 = vmul.f32 %v3514_v50, %v1666_v63  ;;  %v1663_v49 = vsel %vm1660_vm8, %v1662_v39, %v1658_v55  ;;  %v1870_v52 = vpop.f32.mrf.mxu2 }
 0x243   : > { %2178 = vmatmul.msk.f32.gmra.mxu3 %vm610_vm1, %v3207_v54  ;;  %v1459_v56 = vpop.permute.xlu1 %1458  ;;  %v1634_v54 = vor.u32 1.1754944e-38, %v1633_v32  ;;  %v1668_v6 = vadd.f32 %v3514_v50, %v1667_v24  ;;  %v1335_v34 = vpop.permute.xlu2 %1334 }
 0x244   : > { %v1263_v18 = vpop.permute.xlu0 %1262  ;;  %v3510_v1 = vadd.f32 %v1459_v56, %v1365_v40 }
 0x245   : > { %v1635_v27 = vsel %vm1632_vm15, %v1634_v54, %v1630_v14  ;;  %v1299_v62 = vadd.f32 %v1263_v18, %v1155_v15  ;;  %v1672_v18 = vsel %vm1671_vm11, %v3514_v50, %v1668_v6  ;;  %v3560_v14 = vld [vmem:[%s3673_s7] ss:$0 sm:$0xff] }
 0x246   : > { %v1729_v2 = vmul.f32 %v1635_v27, %v1425_v47  ;;  %2392 = vrcp.f32 %v3510_v1  ;;  %v1689_v51 = vand.u32 2147483648, %v3510_v1  ;;  %vm1683_vm14 = vweird.f32 %v3510_v1 }
 0x247   : > { %v1427_v13 = vadd.f32 %v3486_v26, %v1299_v62  ;;  %v1687_v36 = vand.u32 2147483647, %v3510_v1 }
 0x248   : > { %v1690_v8 = vor.u32 1.1754944e-38, %v1689_v51 }
 0x249   : > { %v1731_v26 = vmul.f32 %v1663_v49, %v1427_v13  ;;  %vm1688_vm0 = vcmp.eq.f32.partialorder %v1687_v36, 8.507059e+37 }
 0x24b   : > { %2179 = vmatmul.msk.f32.gmra.mxu3 %vm610_vm1, %v1729_v2  ;;  %v1121_v22 = vpop.permute.xlu1 %1120 }
 0x24c   : > { %v1205_v30 = vpop.permute.xlu0 %1204  ;;  %v3530_v12 = vpop.eup %2392  ;;  %v1156_v58 = vadd.f32 %v1121_v22, %v3343_v61  ;;  %v1673_v61 = vand.u32 2147483647, %v3494_v11 }
 0x24d   : > { %v1238_v53 = vadd.f32 %v1205_v30, %v3346_v28  ;;  %v1679_v38 = vmul.f32 %v3530_v12, %v3510_v1  ;;  %vm1684_vm13 = vweird.f32 %v3530_v12  ;;  %v1395_v22 = vpop.permute.xlu2 %1394 }
 0x24e   : > { %vm1674_vm12 = vcmp.eq.f32.partialorder %v1673_v61, 8.507059e+37  ;;  %vm1685_vm15 = vmor %vm1683_vm14, %vm1684_vm13 }
 0x24f   : > { %v1366_v23 = vadd.f32 %v1333_v16, %v1238_v53  ;;  %v1680_v46 = vsub.f32 1.0, %v1679_v38  ;;  %v1677_v54 = vsel %vm1674_vm12, %v1676_v42, %v1672_v18 }
 0x251   : > { %v1681_v47 = vmul.f32 %v3530_v12, %v1680_v46 }
 0x253   : > { %2180 = vmatmul.msk.f32.gmra.mxu3 %vm610_vm1, %v1730_v25  ;;  %v1461_v28 = vpop.permute.xlu1 %1460  ;;  %v1682_v27 = vadd.f32 %v3530_v12, %v1681_v47 }
 0x254   : > { %v1265_v9 = vpop.permute.xlu0 %1264  ;;  %v3536_v29 = vadd.f32 %v1461_v28, %v1366_v23 }
 0x255   : > { %v1300_v60 = vadd.f32 %v1265_v9, %v1156_v58  ;;  %v1686_v44 = vsel %vm1685_vm15, %v3530_v12, %v1682_v27  ;;  %v1397_v13 = vpop.permute.xlu2 %1396 }
 0x256   : > { %2394 = vrcp.f32 %v3536_v29  ;;  %v1691_v15 = vsel %vm1688_vm0, %v1690_v8, %v1686_v44  ;;  %vm1697_vm3 = vweird.f32 %v3536_v29  ;;  %v1703_v23 = vand.u32 2147483648, %v3536_v29 }
 0x257   : > { %v1428_v56 = vadd.f32 %v1393_v5, %v1300_v60  ;;  %v1701_v9 = vand.u32 2147483647, %v3536_v29 }
 0x258   : > { %v1704_v39 = vor.u32 1.1754944e-38, %v1703_v23 }
 0x259   : > { %v1732_v35 = vmul.f32 %v1677_v54, %v1428_v56  ;;  %vm1702_vm5 = vcmp.eq.f32.partialorder %v1701_v9, 8.507059e+37 }
 0x25b   : > { %2181 = vmatmul.msk.f32.gmra.mxu3 %vm610_vm1, %v1731_v26  ;;  %v1123_v31 = vpop.permute.xlu1 %1122 }
 0x25c   : > { %v3551_v20 = vpop.eup %2394  ;;  %v1207_v32 = vpop.permute.xlu0 %1206  ;;  %v1157_v43 = vadd.f32 %v1123_v31, %v3389_v37 }
 0x25d   : > { %v1239_v21 = vadd.f32 %v1207_v32, %v3391_v10  ;;  %v1693_v11 = vmul.f32 %v3551_v20, %v3536_v29  ;;  %v1873_v37 = vpop.f32.mrf.mxu2  ;;  %vm1698_vm2 = vweird.f32 %v3551_v20  ;;  %v1399_v32 = vpop.permute.xlu2 %1398 }
 0x25e   : > { %vm1699_vm4 = vmor %vm1697_vm3, %vm1698_vm2 }
 0x25f   : > { %v1805_v16 = vpop.f32.mrf.mxu3  ;;  %v1367_v0 = vadd.f32 %v1335_v34, %v1239_v21  ;;  %v1694_v2 = vsub.f32 1.0, %v1693_v11 }
 0x260   : > { %v1871_v40 = vadd.f32 %v1870_v52, %v1805_v16 }
 0x261   : > { %v1695_v33 = vmul.f32 %v3551_v20, %v1694_v2 }
 0x262   : > { %v1922_v10 = vadd.f32 %v3560_v14, %v1871_v40 }
 0x263   : > { %2182 = vmatmul.msk.f32.gmra.mxu3 %vm610_vm1, %v1732_v35  ;;  %v1463_v50 = vpop.permute.xlu1 %1462  ;;  %v1696_v62 = vadd.f32 %v3551_v20, %v1695_v33 }
 0x264   : > { %v1938_v4 = vmax.f32 %v1922_v10, 0.0  ;;  %v1267_v30 = vpop.permute.xlu0 %1266  ;;  %v1495_v45 = vadd.f32 %v1463_v50, %v1367_v0 }
 0x265   : > { %v1301_v7 = vadd.f32 %v1267_v30, %v1157_v43  ;;  %v1700_v24 = vsel %vm1699_vm4, %v3551_v20, %v1696_v62  ;;  %v1876_v61 = vpop.f32.mrf.mxu2 }
 0x266   : > { %1954 = vst [vmem:[%s3575_s26] sm:$0xff] %v1938_v4  ;;  %2396 = vrcp.f32 %v1495_v45  ;;  %v1705_v46 = vsel %vm1702_vm5, %v1704_v39, %v1700_v24  ;;  %v1717_v34 = vand.u32 2147483648, %v1495_v45  ;;  %vm1711_vm7 = vweird.f32 %v1495_v45 }
 0x267   : > { %v1429_v53 = vadd.f32 %v1395_v22, %v1301_v7  ;;  %v1715_v29 = vand.u32 2147483647, %v1495_v45 }
 0x268   : > { %v1808_v1 = vpop.f32.mrf.mxu3  ;;  %v1718_v56 = vor.u32 1.1754944e-38, %v1717_v34 }
 0x269   : > { %v1874_v5 = vadd.f32 %v1873_v37, %v1808_v1  ;;  %v1733_v41 = vmul.f32 %v1691_v15, %v1429_v53  ;;  %vm1716_vm9 = vcmp.eq.f32.partialorder %v1715_v29, 8.507059e+37 }
 0x26b   : > { %v1923_v63 = vadd.f32 %v3560_v14, %v1874_v5  ;;  %2183 = vmatmul.msk.f32.gmra.mxu3 %vm610_vm1, %v1733_v41  ;;  %v1269_v12 = vpop.permute.xlu1 %1268 }
 0x26c   : > { %v2397_v25 = vpop.eup %2396  ;;  %v1125_v19 = vpop.permute.xlu0 %1124 }
 0x26d   : > { %v1707_v17 = vmul.f32 %v2397_v25, %v1495_v45  ;;  %v1939_v28 = vmax.f32 %v1923_v63, 0.0  ;;  %v1158_v57 = vadd.f32 %v1125_v19, %v3418_v3  ;;  %vm1712_vm6 = vweird.f32 %v2397_v25  ;;  %v1879_v16 = vpop.f32.mrf.mxu2 }
 0x26e   : > { %vm1713_vm8 = vmor %vm1711_vm7, %vm1712_vm6 }
 0x26f   : > { %v1708_v38 = vsub.f32 1.0, %v1707_v17  ;;  %1955 = vst [vmem:[%s3575_s26 + $0x8] sm:$0xff] %v1939_v28  ;;  %v1302_v55 = vadd.f32 %v1269_v12, %v1158_v57 }
 0x271   : > { %v1430_v58 = vadd.f32 %v1397_v13, %v1302_v55  ;;  %v1709_v49 = vmul.f32 %v2397_v25, %v1708_v38 }
 0x273   : > { %v1734_v60 = vmul.f32 %v1705_v46, %v1430_v58  ;;  %v1710_v26 = vadd.f32 %v2397_v25, %v1709_v49  ;;  %v1271_v48 = vpop.permute.xlu1 %1270 }
 0x274   : > { %v1127_v6 = vpop.permute.xlu0 %1126 }
 0x275   : > { %v1159_v3 = vadd.f32 %v1127_v6, %v3433_v59  ;;  %2184 = vmatmul.msk.f32.gmra.mxu3 %vm610_vm1, %v1734_v60  ;;  %v1714_v20 = vsel %vm1713_vm8, %v2397_v25, %v1710_v26  ;;  %v1882_v10 = vpop.f32.mrf.mxu2 }
 0x276   : > { %v1719_v21 = vsel %vm1716_vm9, %v1718_v56, %v1714_v20 }
 0x277   : > { %v1303_v31 = vadd.f32 %v1271_v48, %v1159_v3 }
 0x279   : > { %v1431_v52 = vadd.f32 %v1399_v32, %v1303_v31  ;;  %v1811_v18 = vpop.f32.mrf.mxu3 }
 0x27a   : > { %v1877_v47 = vadd.f32 %v1876_v61, %v1811_v18 }
 0x27b   : > { %v1735_v42 = vmul.f32 %v1719_v21, %v1431_v52 }
 0x27c   : > { %v1924_v59 = vadd.f32 %v3560_v14, %v1877_v47 }
 0x27d   : > { %2185 = vmatmul.msk.f32.gmra.mxu3 %vm610_vm1, %v1735_v42  ;;  %v1885_v43 = vpop.f32.mrf.mxu2 }
 0x27e   : > { %v1940_v11 = vmax.f32 %v1924_v59, 0.0 }
 0x280   : > { %1956 = vst [vmem:[%s3575_s26 + $0x10] sm:$0xff] %v1940_v11 }
 0x285   : > { %v1888_v36 = vpop.f32.mrf.mxu2 }
 0x289   : > { %v1814_v40 = vpop.f32.mrf.mxu3 }
 0x28a   : > { %v1880_v54 = vadd.f32 %v1879_v16, %v1814_v40 }
 0x28c   : > { %v1925_v35 = vadd.f32 %v3560_v14, %v1880_v54 }
 0x28d   : > { %v1891_v30 = vpop.f32.mrf.mxu2 }
 0x28e   : > { %v1941_v27 = vmax.f32 %v1925_v35, 0.0 }
 0x290   : > { %1957 = vst [vmem:[%s3575_s26 + $0x18] sm:$0xff] %v1941_v27 }
 0x295   : > { %v1894_v53 = vpop.f32.mrf.mxu2 }
 0x299   : > { %v1817_v0 = vpop.f32.mrf.mxu3 }
 0x29a   : > { %v1883_v51 = vadd.f32 %v1882_v10, %v1817_v0 }
 0x29c   : > { %v1926_v2 = vadd.f32 %v3560_v14, %v1883_v51 }
 0x29d   : > { %v1897_v63 = vpop.f32.mrf.mxu2 }
 0x29e   : > { %v1942_v50 = vmax.f32 %v1926_v2, 0.0 }
 0x2a0   : > { %1958 = vst [vmem:[%s3575_s26 + $0x20] sm:$0xff] %v1942_v50 }
 0x2a5   : > { %v1900_v17 = vpop.f32.mrf.mxu2 }
 0x2ad   : > { %v1903_v55 = vpop.f32.mrf.mxu2 }
 0x2ae   : > { %v1820_v22 = vpop.f32.mrf.mxu3 }
 0x2af   : > { %v1886_v4 = vadd.f32 %v1885_v43, %v1820_v22 }
 0x2b1   : > { %v1927_v45 = vadd.f32 %v3560_v14, %v1886_v4 }
 0x2b3   : > { %v1943_v7 = vmax.f32 %v1927_v45, 0.0 }
 0x2b5   : > { %1959 = vst [vmem:[%s3575_s26 + $0x28] sm:$0xff] %v1943_v7  ;;  %v1906_v60 = vpop.f32.mrf.mxu2 }
 0x2b6   : > { %v1823_v44 = vpop.f32.mrf.mxu3 }
 0x2b7   : > { %v1889_v37 = vadd.f32 %v1888_v36, %v1823_v44 }
 0x2b9   : > { %v1928_v8 = vadd.f32 %v3560_v14, %v1889_v37 }
 0x2bb   : > { %v1944_v33 = vmax.f32 %v1928_v8, 0.0 }
 0x2bd   : > { %1960 = vst [vmem:[%s3575_s26 + $0x30] sm:$0xff] %v1944_v33  ;;  %v1909_v48 = vpop.f32.mrf.mxu2 }
 0x2be   : > { %v1826_v1 = vpop.f32.mrf.mxu3 }
 0x2bf   : > { %v1892_v15 = vadd.f32 %v1891_v30, %v1826_v1 }
 0x2c1   : > { %v1929_v5 = vadd.f32 %v3560_v14, %v1892_v15 }
 0x2c3   : > { %v1945_v41 = vmax.f32 %v1929_v5, 0.0 }
 0x2c5   : > { %1961 = vst [vmem:[%s3575_s26 + $0x38] sm:$0xff] %v1945_v41  ;;  %v1912_v56 = vpop.f32.mrf.mxu2 }
 0x2c6   : > { %v1829_v62 = vpop.f32.mrf.mxu3 }
 0x2c7   : > { %v1895_v25 = vadd.f32 %v1894_v53, %v1829_v62 }
 0x2c9   : > { %v1930_v19 = vadd.f32 %v3560_v14, %v1895_v25 }
 0x2cb   : > { %v1946_v12 = vmax.f32 %v1930_v19, 0.0 }
 0x2cd   : > { %1962 = vst [vmem:[%s3575_s26 + $0x40] sm:$0xff] %v1946_v12  ;;  %v1915_v42 = vpop.f32.mrf.mxu2 }
 0x2ce   : > { %v1832_v23 = vpop.f32.mrf.mxu3 }
 0x2cf   : > { %v1898_v28 = vadd.f32 %v1897_v63, %v1832_v23 }
 0x2d1   : > { %v1931_v57 = vadd.f32 %v3560_v14, %v1898_v28 }
 0x2d3   : > { %v1947_v9 = vmax.f32 %v1931_v57, 0.0 }
 0x2d5   : > { %1963 = vst [vmem:[%s3575_s26 + $0x48] sm:$0xff] %v1947_v9 }
 0x2d6   : > { %v1835_v13 = vpop.f32.mrf.mxu3 }
 0x2d7   : > { %v1901_v38 = vadd.f32 %v1900_v17, %v1835_v13 }
 0x2d9   : > { %v1932_v24 = vadd.f32 %v3560_v14, %v1901_v38 }
 0x2db   : > { %v1948_v39 = vmax.f32 %v1932_v24, 0.0 }
 0x2dd   : > { %1964 = vst [vmem:[%s3575_s26 + $0x50] sm:$0xff] %v1948_v39 }
 0x2de   : > { %v1838_v58 = vpop.f32.mrf.mxu3 }
 0x2df   : > { %v1904_v49 = vadd.f32 %v1903_v55, %v1838_v58 }
 0x2e1   : > { %v1933_v46 = vadd.f32 %v3560_v14, %v1904_v49 }
 0x2e3   : > { %v1949_v26 = vmax.f32 %v1933_v46, 0.0 }
 0x2e5   : > { %1965 = vst [vmem:[%s3575_s26 + $0x58] sm:$0xff] %v1949_v26 }
 0x2e6   : > { %v1841_v6 = vpop.f32.mrf.mxu3 }
 0x2e7   : > { %v1907_v34 = vadd.f32 %v1906_v60, %v1841_v6 }
 0x2e9   : > { %v1934_v3 = vadd.f32 %v3560_v14, %v1907_v34 }
 0x2eb   : > { %v1950_v29 = vmax.f32 %v1934_v3, 0.0 }
 0x2ed   : > { %1966 = vst [vmem:[%s3575_s26 + $0x60] sm:$0xff] %v1950_v29 }
 0x2ee   : > { %v1844_v31 = vpop.f32.mrf.mxu3 }
 0x2ef   : > { %v1910_v61 = vadd.f32 %v1909_v48, %v1844_v31 }
 0x2f1   : > { %v1935_v20 = vadd.f32 %v3560_v14, %v1910_v61 }
 0x2f3   : > { %v1951_v32 = vmax.f32 %v1935_v20, 0.0 }
 0x2f5   : > { %1967 = vst [vmem:[%s3575_s26 + $0x68] sm:$0xff] %v1951_v32 }
 0x2f8   : > { %v1847_v52 = vpop.f32.mrf.mxu3 }
 0x2f9   : > { %v1913_v18 = vadd.f32 %v1912_v56, %v1847_v52 }
 0x2fb   : > { %v1936_v47 = vadd.f32 %v3560_v14, %v1913_v18 }
 0x2fd   : > { %v1952_v21 = vmax.f32 %v1936_v47, 0.0 }
 0x2ff   : > { %1968 = vst [vmem:[%s3575_s26 + $0x70] sm:$0xff] %v1952_v21 }
 0x300   : > { %v1850_v59 = vpop.f32.mrf.mxu3 }
 0x301   : > { %v1916_v11 = vadd.f32 %v1915_v42, %v1850_v59 }
 0x303   : > { %v1937_v16 = vadd.f32 %v3560_v14, %v1916_v11 }
 0x305   : > { %v1953_v40 = vmax.f32 %v1937_v16, 0.0 }
 0x307   : > { %1969 = vst [vmem:[%s3575_s26 + $0x78] sm:$0xff] %v1953_v40 }
 0x308   : > { %2441 = shalt.err (!%p2438_p7)
}
 0x309   : > { %s2513_s25 = smov 128   ;;  %s2514_s26 = smov 8  }
 0x30a   : > { %2224 = dma.vmem_to_hbm [thread:$0]  (%p2611_p3), %s1986_s30, 2048, %s1988_s1, %s1971_s24, %s2513_s25, %s2513_s25, %s2514_s26  }
 0x30b PF: > { %p2230_p9 = scmp.ge.s32.totalorder %s2508_s12, 2  ;;  %s2002_s14 = sand.u32 1, %s2480_s27  }
 0x30c   : > { %s2003_s22 = scalar_lea.sflag [#allocation3], %s2002_s14 }
 0x30d   : > { %p2227_p10 = pnand %p2230_p9, %p2620_p8 }
 0x30f   : > { %p2228_p11 = pneg %p2227_p10 }
 0x311   : > { %2475 = dma.done.wait (%p2228_p11), %s2003_s22, 2048  }
 0x312   : > { %2477 = vsyncadd (%p2228_p11), %s2003_s22, 4294965248  ;;  %s21_s12 = sadd.s32 1, %s2508_s12   ;;  %s3693_s27 = smov %s2484_s28 }
 0x313   : > { %p18_p12 = scmp.ge.s32.totalorder %s21_s12, 6   ;;  %s3694_s28 = smov %s2488_s29 }
 0x314   : > { %s3695_s29 = smov %s2629_s23  ;;  %s3696_s30 = smov %s2500_s10 }
 0x315   : > { %s3697_s9 = smov %s2504_s11  ;;  %s3698_s10 = smov %s3701_s15 }
 0x316   : > { %s3699_s11 = smov %s3705_s16  ;;  %20 = sbr.rel (!%p18_p12) target bundleno = 7 (0x7), region = 93 }
 0x31b   :  { %2009 = vsyncpa [#allocation3], 1 }
 0x31c   :  { %2011 = vsyncpa [#allocation3 + $0x1], 1 }

</bundles_post_ra>
